<compile_context>
chip_gen: v7x
topology: tpu7x:2x2x1
jax: 0.10.0
libtpu: 0.0.40
codegen_flags: <defaults>
</compile_context>

<pallas_src>
import math
import functools

import jax
import jax.numpy as jnp
from jax.experimental import pallas as pl
from jax.experimental.pallas import tpu as pltpu


def mha_kernel(*refs, num_heads, depth, has_mask):
    kh_ref, vh_ref = refs[-2:]          # bf16 VMEM scratch: cached K/V heads
    o_ref = refs[-3]
    if has_mask:
        xq_ref, xk_ref, xv_ref, mask_ref = refs[:4]
        (wq_ref, bq_ref, wk_ref, bk_ref,
         wv_ref, bv_ref, wo_ref, bo_ref) = refs[4:12]
    else:
        mask_ref = None
        xq_ref, xk_ref, xv_ref = refs[:3]
        (wq_ref, bq_ref, wk_ref, bk_ref,
         wv_ref, bv_ref, wo_ref, bo_ref) = refs[3:11]

    f32, bf16 = jnp.float32, jnp.bfloat16
    bt, tq, d_model = xq_ref.shape      # batch tile, query tile, d_model
    s = xk_ref.shape[1]                 # key/value sequence length
    h = num_heads

    def project(x_ref, w_ref, b_ref, rows):
        # full-width (bt*rows, D) @ (D, D) matmul on the MXU, bf16 in / f32 out
        x = x_ref[...].reshape(bt * rows, d_model)
        y = jnp.dot(x, w_ref[...], preferred_element_type=f32)
        return y + b_ref[...]           # bias stays f32

    def split_heads(x, rows):
        # (bt*rows, D) -> (bt*h, rows, depth): heads batched on the leading axis
        x = x.reshape(bt, rows, h, depth)
        x = jnp.transpose(x, (0, 2, 1, 3))
        return x.reshape(bt * h, rows, depth)

    # ---- K/V projection: once per batch tile, cached in bf16 VMEM scratch ----
    @pl.when(pl.program_id(1) == 0)
    def _():
        k = project(xk_ref, wk_ref, bk_ref, s).astype(bf16)   # cast before relayout
        v = project(xv_ref, wv_ref, bv_ref, s).astype(bf16)
        kh_ref[...] = split_heads(k, s)
        vh_ref[...] = split_heads(v, s)

    scale = 1.0 / math.sqrt(float(depth))
    q = (project(xq_ref, wq_ref, bq_ref, tq) * scale).astype(bf16)
    qh = split_heads(q, tq)                                   # (bt*h, tq, depth)
    kh = kh_ref[...]
    vh = vh_ref[...]

    # Batched QK^T: contraction on the last dim of both operands (no explicit .T)
    att = jnp.einsum('nqd,nkd->nqk', qh, kh,
                     preferred_element_type=f32)              # (bt*h, tq, s) f32
    att = att.reshape(bt, h, tq, s)
    if mask_ref is not None:
        # mask block is (1|bt, 1, tq, s) bf16, already scaled by -1e9
        att = att + mask_ref[...].astype(f32)

    # numerically-stable softmax, all in f32
    att = att - jnp.max(att, axis=-1, keepdims=True)
    e = jnp.exp(att)
    p = e * pl.reciprocal(jnp.sum(e, axis=-1, keepdims=True), approx=True)
    p = p.reshape(bt * h, tq, s).astype(bf16)

    # Batched PV
    o = jnp.einsum('nqk,nkd->nqd', p, vh,
                   preferred_element_type=f32)                # (bt*h, tq, depth) f32

    # merge heads: bf16 before the relayout (half the bytes), then ONE full-D FC.
    # TODO(synk): replace the transpose with einsum('bhqe,hed->bqd', o, wo) once
    # Mosaic lowers multi-contracting-dim dot_general on the MXU path.
    o = o.astype(bf16).reshape(bt, h, tq, depth)
    o = jnp.transpose(o, (0, 2, 1, 3)).reshape(bt * tq, d_model)
    out = jnp.dot(o, wo_ref[...], preferred_element_type=f32) + bo_ref[...]

    o_ref[...] = out.reshape(bt, tq, d_model).astype(o_ref.dtype)


def _default_query_tile(sq):
    """Largest multiple of 8 that divides Sq and is <= 256 (else full Sq)."""
    if sq <= 256:
        return sq
    for cand in range(256, 7, -8):
        if sq % cand == 0:
            return cand
    return sq


def _vmem_limit_bytes():
    """~100 MiB on 128-MiB parts (v5e/v6e), ~56 MiB on 64-MiB parts (v7x)."""
    try:
        cap = pltpu.get_tpu_info().vmem_capacity_bytes
    except Exception:
        cap = 64 * 1024 * 1024
    return int(min(max(cap - (8 << 20), 32 << 20), 100 << 20))


def multi_head_attention(xv, xk, xq, mask, params, num_heads,
                         *, block_b=None, block_q=None):
    """params = (wq, bq, wk, bk, wv, bv, wo, bo); weights shaped (D_in, D_out).

    mask: None, or (1, 1, Sq, Sk), or (B, 1, Sq, Sk) of 0/1 — added as mask*-1e9.
    block_b / block_q: batch rows and query rows per grid step. Defaults:
    block_b=1 (batch axis "parallel" with extent B -> megacore sharding on v7x)
    and block_q = largest multiple of 8 dividing Sq that is <= 256.
    VMEM sizing guidance (per core): K+V caches (2*bt*h*Sk*depth*2B), the f32
    att tensor (bt*h*tq*Sk*4B) and the 4 DxD bf16 weights (single-buffered)
    must fit ~56 MiB on v7x / ~100 MiB on v5e/v6e; prefer bt=1, tq=128-256 for
    Sk >= 2048.
    """
    B, Sq, D = xq.shape
    Sk = xk.shape[1]
    assert D % num_heads == 0
    depth = D // num_heads
    wq, bq, wk, bk, wv, bv, wo, bo = params

    bt = block_b if block_b is not None else (1 if B > 1 else B)
    tq = block_q if block_q is not None else _default_query_tile(Sq)
    assert B % bt == 0 and Sq % tq == 0
    assert tq % 8 == 0 or tq == Sq, "block_q must be a multiple of 8 (or == Sq)"
    grid = (B // bt, Sq // tq)

    # bf16 matmul operands (halves DMA bytes + VMEM residency); biases stay f32.
    bf16 = jnp.bfloat16
    xq_b, xk_b, xv_b = xq.astype(bf16), xk.astype(bf16), xv.astype(bf16)
    wq_b, wk_b, wv_b, wo_b = (w.astype(bf16) for w in (wq, wk, wv, wo))

    has_mask = mask is not None
    single_batch_step = grid[0] == 1
    buf1 = pl.Buffered(1)   # single-buffer grid-invariant blocks (halves VMEM)

    q_spec = pl.BlockSpec((bt, tq, D), lambda b, qi: (b, qi, 0))
    if single_batch_step:
        # K/V block never changes -> no re-DMA to hide, single buffer is free.
        kv_spec = pl.BlockSpec((bt, Sk, D), lambda b, qi: (b, 0, 0),
                               pipeline_mode=buf1)
    else:
        kv_spec = pl.BlockSpec((bt, Sk, D), lambda b, qi: (b, 0, 0))
    w_spec = pl.BlockSpec((D, D), lambda b, qi: (0, 0), pipeline_mode=buf1)
    bias_spec = pl.BlockSpec((1, D), lambda b, qi: (0, 0), pipeline_mode=buf1)
    out_spec = pl.BlockSpec((bt, tq, D), lambda b, qi: (b, qi, 0))

    inputs = [xq_b, xk_b, xv_b]
    in_specs = [q_spec, kv_spec, kv_spec]
    if has_mask:
        mb = mask.shape[0]
        assert mb in (1, B) and mask.shape[2] == Sq and mask.shape[3] == Sk
        if mb == 1:
            mask_spec = pl.BlockSpec((1, 1, tq, Sk), lambda b, qi: (0, 0, qi, 0))
        else:
            mask_spec = pl.BlockSpec((bt, 1, tq, Sk), lambda b, qi: (b, 0, qi, 0))
        # pre-scale by -1e9 and ship in bf16: half the DMA, no in-kernel multiply
        inputs.append((mask.astype(jnp.float32) * (-1e9)).astype(bf16))
        in_specs.append(mask_spec)
    inputs += [wq_b, bq, wk_b, bk, wv_b, bv, wo_b, bo]
    in_specs += [w_spec, bias_spec, w_spec, bias_spec,
                 w_spec, bias_spec, w_spec, bias_spec]

    kernel = functools.partial(mha_kernel, num_heads=num_heads,
                               depth=depth, has_mask=has_mask)

    # bf16 K/V head caches persist across the query ("arbitrary") grid axis.
    scratch_shapes = [pltpu.VMEM((bt * num_heads, Sk, depth), bf16),
                      pltpu.VMEM((bt * num_heads, Sk, depth), bf16)]

    # TODO(synk): for very long Sk (esp. v7x, 64 MiB VMEM) tile K/V along Sk
    # with an inner pltpu.emit_pipeline + online (flash) softmax so the full
    # (bt*h, tq, Sk) f32 att tensor never materializes.
    return pl.pallas_call(
        kernel,
        out_shape=jax.ShapeDtypeStruct((B, Sq, D), xq.dtype),
        grid=grid,
        in_specs=in_specs,
        out_specs=out_spec,
        scratch_shapes=scratch_shapes,
        compiler_params=pltpu.CompilerParams(
            dimension_semantics=("parallel", "arbitrary"),
            vmem_limit_bytes=_vmem_limit_bytes()),
    )(*inputs)


def reference_mha(xv, xk, xq, mask, params, num_heads):
    """Pure-JAX (f32) mirror of the PyTorch forward pass, for validation."""
    B, S, D = xq.shape
    depth = D // num_heads
    wq, bq, wk, bk, wv, bv, wo, bo = params

    def split(x):
        return jnp.transpose(x.reshape(B, S, num_heads, depth), (0, 2, 1, 3))

    q = split(xq @ wq + bq)
    k = split(xk @ wk + bk)
    v = split(xv @ wv + bv)

    att = jnp.einsum("bhqd,bhkd->bhqk", q, k) / jnp.sqrt(jnp.float32(depth))
    if mask is not None:
        att = att + mask * (-1e9)
    w = jax.nn.softmax(att, axis=-1)
    out = jnp.einsum("bhqk,bhkd->bhqd", w, v)
    out = jnp.transpose(out, (0, 2, 1, 3)).reshape(B, S, D)
    return out @ wo + bo


def init_params(key, d_model):
    """Deterministic nn.Linear-style init: U(-1/sqrt(fan_in), 1/sqrt(fan_in))."""
    bound = 1.0 / math.sqrt(d_model)
    keys = jax.random.split(key, 8)
    params = []
    for i in range(4):
        w = jax.random.uniform(keys[2 * i], (d_model, d_model), jnp.float32,
                               -bound, bound)          # stored as (in, out)
        b = jax.random.uniform(keys[2 * i + 1], (1, d_model), jnp.float32,
                               -bound, bound)
        params += [w, b]
    return tuple(params)


if __name__ == "__main__":
    B, S, D, H = 2, 16, 32, 4

    key = jax.random.PRNGKey(0)
    kp, kq, kk, kv = jax.random.split(key, 4)

    params = init_params(kp, D)

    xq = jax.random.normal(kq, (B, S, D), jnp.float32)
    xk = jax.random.normal(kk, (B, S, D), jnp.float32)
    xv = jax.random.normal(kv, (B, S, D), jnp.float32)

    # causal mask: 1.0 where attention is disallowed (matches `mask * -1e9`)
    causal = jnp.triu(jnp.ones((S, S), jnp.float32), k=1)
    mask = causal[None, None]

    ref = reference_mha(xv, xk, xq, mask, params, H)

    # default tiling: bt=1 ("parallel" batch axis of extent B), tq=S
    out = jax.block_until_ready(multi_head_attention(xv, xk, xq, mask, params, H))
    assert out.shape == (B, S, D)
    assert jnp.allclose(out, ref, rtol=2e-2, atol=2e-2), "mismatch (default tiling)"

    # multi query-tile grid: exercises the cached-K/V VMEM scratch across qi
    # steps and the single-buffered K/V spec (batch axis has a single step)
    out2 = jax.block_until_ready(
        multi_head_attention(xv, xk, xq, mask, params, H, block_b=2, block_q=8))
    assert jnp.allclose(out2, ref, rtol=2e-2, atol=2e-2), "mismatch (bt=2, tq=8)"

    # batch-parallel + multi query-tile grid
    out3 = jax.block_until_ready(
        multi_head_attention(xv, xk, xq, mask, params, H, block_b=1, block_q=8))
    assert jnp.allclose(out3, ref, rtol=2e-2, atol=2e-2), "mismatch (bt=1, tq=8)"

    # no-mask path
    ref_nm = reference_mha(xv, xk, xq, None, params, H)
    out_nm = jax.block_until_ready(
        multi_head_attention(xv, xk, xq, None, params, H, block_q=8))
    assert jnp.allclose(out_nm, ref_nm, rtol=2e-2, atol=2e-2), "mismatch (no mask)"

    print("KERNEL_OK")
</pallas_src>

<mosaic_0001>
module attributes {stable_mosaic.version = 11 : i64} {
  func.func @mha_kernel(%arg0: i32, %arg1: i32, %arg2: memref<1x16x32xbf16, #tpu.memory_space<vmem>>, %arg3: memref<1x16x32xbf16, #tpu.memory_space<vmem>>, %arg4: memref<1x16x32xbf16, #tpu.memory_space<vmem>>, %arg5: memref<1x1x16x16xbf16, #tpu.memory_space<vmem>>, %arg6: memref<32x32xbf16, #tpu.memory_space<vmem>>, %arg7: memref<1x32xf32, #tpu.memory_space<vmem>>, %arg8: memref<32x32xbf16, #tpu.memory_space<vmem>>, %arg9: memref<1x32xf32, #tpu.memory_space<vmem>>, %arg10: memref<32x32xbf16, #tpu.memory_space<vmem>>, %arg11: memref<1x32xf32, #tpu.memory_space<vmem>>, %arg12: memref<32x32xbf16, #tpu.memory_space<vmem>>, %arg13: memref<1x32xf32, #tpu.memory_space<vmem>>, %arg14: memref<1x16x32xf32, #tpu.memory_space<vmem>>, %arg15: memref<4x16x8xbf16, #tpu.memory_space<vmem>>, %arg16: memref<4x16x8xbf16, #tpu.memory_space<vmem>>) attributes {dimension_semantics = [#tpu.dimension_semantics<parallel>, #tpu.dimension_semantics<arbitrary>], iteration_bounds = array<i64: 2, 1>, scalar_prefetch = 0 : i64, scratch_operands = 2 : i64, tpu.core_type = #tpu.core_type<tc>, window_params = [{transform_indices = @transform_0, window_bounds = array<i64: 1, 16, 32>}, {transform_indices = @transform_1, window_bounds = array<i64: 1, 16, 32>}, {transform_indices = @transform_2, window_bounds = array<i64: 1, 16, 32>}, {transform_indices = @transform_3, window_bounds = array<i64: 1, 1, 16, 16>}, {pipeline_mode = #tpu.pipeline_mode<synchronous>, transform_indices = @transform_4, window_bounds = array<i64: 32, 32>}, {pipeline_mode = #tpu.pipeline_mode<synchronous>, transform_indices = @transform_5, window_bounds = array<i64: 1, 32>}, {pipeline_mode = #tpu.pipeline_mode<synchronous>, transform_indices = @transform_6, window_bounds = array<i64: 32, 32>}, {pipeline_mode = #tpu.pipeline_mode<synchronous>, transform_indices = @transform_7, window_bounds = array<i64: 1, 32>}, {pipeline_mode = #tpu.pipeline_mode<synchronous>, transform_indices = @transform_8, window_bounds = array<i64: 32, 32>}, {pipeline_mode = #tpu.pipeline_mode<synchronous>, transform_indices = @transform_9, window_bounds = array<i64: 1, 32>}, {pipeline_mode = #tpu.pipeline_mode<synchronous>, transform_indices = @transform_10, window_bounds = array<i64: 32, 32>}, {pipeline_mode = #tpu.pipeline_mode<synchronous>, transform_indices = @transform_11, window_bounds = array<i64: 1, 32>}, {transform_indices = @transform_12, window_bounds = array<i64: 1, 16, 32>}]} {
    %c0_i32 = arith.constant 0 : i32
    %0 = arith.cmpi eq, %arg1, %c0_i32 : i32
    %1 = arith.extui %0 : i1 to i32
    %c0_i32_0 = arith.constant 0 : i32
    %2 = arith.cmpi ne, %1, %c0_i32_0 : i32
    scf.if %2 {
      %c0_30 = arith.constant 0 : index
      %c0_31 = arith.constant 0 : index
      %c0_32 = arith.constant 0 : index
      %48 = vector.load %arg3[%c0_30, %c0_31, %c0_32] : memref<1x16x32xbf16, #tpu.memory_space<vmem>>, vector<1x16x32xbf16>
      %49 = vector.shape_cast %48 : vector<1x16x32xbf16> to vector<16x32xbf16>
      %c0_33 = arith.constant 0 : index
      %c0_34 = arith.constant 0 : index
      %50 = vector.load %arg8[%c0_33, %c0_34] : memref<32x32xbf16, #tpu.memory_space<vmem>>, vector<32x32xbf16>
      %cst_35 = arith.constant dense<0.000000e+00> : vector<16x32xf32>
      %51 = tpu.matmul %49, %50, %cst_35 {dimension_numbers = #tpu.dot_dimension_numbers<[1], [0], [0], [1], [0, 0, 1, 1], [], []>} : vector<16x32xbf16>, vector<32x32xbf16>, vector<16x32xf32> -> vector<16x32xf32>
      %c0_36 = arith.constant 0 : index
      %c0_37 = arith.constant 0 : index
      %52 = vector.load %arg9[%c0_36, %c0_37] : memref<1x32xf32, #tpu.memory_space<vmem>>, vector<1x32xf32>
      %53 = vector.broadcast %52 : vector<1x32xf32> to vector<16x32xf32>
      %54 = arith.addf %51, %53 : vector<16x32xf32>
      %55 = arith.truncf %54 : vector<16x32xf32> to vector<16x32xbf16>
      %c0_38 = arith.constant 0 : index
      %c0_39 = arith.constant 0 : index
      %c0_40 = arith.constant 0 : index
      %56 = vector.load %arg4[%c0_38, %c0_39, %c0_40] : memref<1x16x32xbf16, #tpu.memory_space<vmem>>, vector<1x16x32xbf16>
      %57 = vector.shape_cast %56 : vector<1x16x32xbf16> to vector<16x32xbf16>
      %c0_41 = arith.constant 0 : index
      %c0_42 = arith.constant 0 : index
      %58 = vector.load %arg10[%c0_41, %c0_42] : memref<32x32xbf16, #tpu.memory_space<vmem>>, vector<32x32xbf16>
      %cst_43 = arith.constant dense<0.000000e+00> : vector<16x32xf32>
      %59 = tpu.matmul %57, %58, %cst_43 {dimension_numbers = #tpu.dot_dimension_numbers<[1], [0], [0], [1], [0, 0, 1, 1], [], []>} : vector<16x32xbf16>, vector<32x32xbf16>, vector<16x32xf32> -> vector<16x32xf32>
      %c0_44 = arith.constant 0 : index
      %c0_45 = arith.constant 0 : index
      %60 = vector.load %arg11[%c0_44, %c0_45] : memref<1x32xf32, #tpu.memory_space<vmem>>, vector<1x32xf32>
      %61 = vector.broadcast %60 : vector<1x32xf32> to vector<16x32xf32>
      %62 = arith.addf %59, %61 : vector<16x32xf32>
      %63 = arith.truncf %62 : vector<16x32xf32> to vector<16x32xbf16>
      %64 = vector.shape_cast %55 : vector<16x32xbf16> to vector<1x16x4x8xbf16>
      %65 = tpu.transpose %64, [0, 2, 1, 3] : vector<1x16x4x8xbf16> -> vector<1x4x16x8xbf16>
      %66 = vector.shape_cast %65 : vector<1x4x16x8xbf16> to vector<4x16x8xbf16>
      %c0_46 = arith.constant 0 : index
      %c0_47 = arith.constant 0 : index
      %c0_48 = arith.constant 0 : index
      %67 = vector.load %arg15[%c0_46, %c0_47, %c0_48] : memref<4x16x8xbf16, #tpu.memory_space<vmem>>, vector<4x16x8xbf16>
      tpu.vector_store %arg15[%c0_46, %c0_47, %c0_48], %66 {strides = array<i32>} : memref<4x16x8xbf16, #tpu.memory_space<vmem>>, vector<4x16x8xbf16>,
      %68 = vector.shape_cast %63 : vector<16x32xbf16> to vector<1x16x4x8xbf16>
      %69 = tpu.transpose %68, [0, 2, 1, 3] : vector<1x16x4x8xbf16> -> vector<1x4x16x8xbf16>
      %70 = vector.shape_cast %69 : vector<1x4x16x8xbf16> to vector<4x16x8xbf16>
      %c0_49 = arith.constant 0 : index
      %c0_50 = arith.constant 0 : index
      %c0_51 = arith.constant 0 : index
      %71 = vector.load %arg16[%c0_49, %c0_50, %c0_51] : memref<4x16x8xbf16, #tpu.memory_space<vmem>>, vector<4x16x8xbf16>
      tpu.vector_store %arg16[%c0_49, %c0_50, %c0_51], %70 {strides = array<i32>} : memref<4x16x8xbf16, #tpu.memory_space<vmem>>, vector<4x16x8xbf16>,
    } else {
    }
    %c0 = arith.constant 0 : index
    %c0_1 = arith.constant 0 : index
    %c0_2 = arith.constant 0 : index
    %3 = vector.load %arg2[%c0, %c0_1, %c0_2] : memref<1x16x32xbf16, #tpu.memory_space<vmem>>, vector<1x16x32xbf16>
    %4 = vector.shape_cast %3 : vector<1x16x32xbf16> to vector<16x32xbf16>
    %c0_3 = arith.constant 0 : index
    %c0_4 = arith.constant 0 : index
    %5 = vector.load %arg6[%c0_3, %c0_4] : memref<32x32xbf16, #tpu.memory_space<vmem>>, vector<32x32xbf16>
    %cst = arith.constant dense<0.000000e+00> : vector<16x32xf32>
    %6 = tpu.matmul %4, %5, %cst {dimension_numbers = #tpu.dot_dimension_numbers<[1], [0], [0], [1], [0, 0, 1, 1], [], []>} : vector<16x32xbf16>, vector<32x32xbf16>, vector<16x32xf32> -> vector<16x32xf32>
    %c0_5 = arith.constant 0 : index
    %c0_6 = arith.constant 0 : index
    %7 = vector.load %arg7[%c0_5, %c0_6] : memref<1x32xf32, #tpu.memory_space<vmem>>, vector<1x32xf32>
    %8 = vector.broadcast %7 : vector<1x32xf32> to vector<16x32xf32>
    %9 = arith.addf %6, %8 : vector<16x32xf32>
    %cst_7 = arith.constant 0.353553385 : f32
    %10 = vector.broadcast %cst_7 : f32 to vector<16x32xf32>
    %11 = arith.mulf %9, %10 : vector<16x32xf32>
    %12 = arith.truncf %11 : vector<16x32xf32> to vector<16x32xbf16>
    %13 = vector.shape_cast %12 : vector<16x32xbf16> to vector<1x16x4x8xbf16>
    %14 = tpu.transpose %13, [0, 2, 1, 3] : vector<1x16x4x8xbf16> -> vector<1x4x16x8xbf16>
    %15 = vector.shape_cast %14 : vector<1x4x16x8xbf16> to vector<4x16x8xbf16>
    %c0_8 = arith.constant 0 : index
    %c0_9 = arith.constant 0 : index
    %c0_10 = arith.constant 0 : index
    %16 = vector.load %arg15[%c0_8, %c0_9, %c0_10] : memref<4x16x8xbf16, #tpu.memory_space<vmem>>, vector<4x16x8xbf16>
    %c0_11 = arith.constant 0 : index
    %c0_12 = arith.constant 0 : index
    %c0_13 = arith.constant 0 : index
    %17 = vector.load %arg16[%c0_11, %c0_12, %c0_13] : memref<4x16x8xbf16, #tpu.memory_space<vmem>>, vector<4x16x8xbf16>
    "tpu.trace_start"() <{level = 10 : i32, message = "nqd,nkd->nqk"}> : () -> ()
    %cst_14 = arith.constant dense<0.000000e+00> : vector<4x16x16xf32>
    %18 = tpu.matmul %15, %16, %cst_14 {dimension_numbers = #tpu.dot_dimension_numbers<[2], [2], [1], [1], [0, 0, 0, 1, 1, 1], [0], [0]>} : vector<4x16x8xbf16>, vector<4x16x8xbf16>, vector<4x16x16xf32> -> vector<4x16x16xf32>
    "tpu.trace_stop"() : () -> ()
    %19 = vector.shape_cast %18 : vector<4x16x16xf32> to vector<1x4x16x16xf32>
    %c0_15 = arith.constant 0 : index
    %c0_16 = arith.constant 0 : index
    %c0_17 = arith.constant 0 : index
    %c0_18 = arith.constant 0 : index
    %20 = vector.load %arg5[%c0_15, %c0_16, %c0_17, %c0_18] : memref<1x1x16x16xbf16, #tpu.memory_space<vmem>>, vector<1x1x16x16xbf16>
    %21 = arith.extf %20 : vector<1x1x16x16xbf16> to vector<1x1x16x16xf32>
    %22 = vector.broadcast %21 : vector<1x1x16x16xf32> to vector<1x4x16x16xf32>
    %23 = arith.addf %19, %22 : vector<1x4x16x16xf32>
    %cst_19 = arith.constant dense<0xFF800000> : vector<1x4x16xf32>
    %24 = vector.multi_reduction <maximumf>, %23, %cst_19 [3] : vector<1x4x16x16xf32> to vector<1x4x16xf32>
    %25 = vector.shape_cast %24 : vector<1x4x16xf32> to vector<1x4x16x1xf32>
    %26 = vector.broadcast %25 : vector<1x4x16x1xf32> to vector<1x4x16x16xf32>
    %27 = arith.subf %23, %26 : vector<1x4x16x16xf32>
    %28 = math.exp %27 : vector<1x4x16x16xf32>
    %cst_20 = arith.constant dense<0.000000e+00> : vector<1x4x16xf32>
    %29 = vector.multi_reduction <add>, %28, %cst_20 [3] : vector<1x4x16x16xf32> to vector<1x4x16xf32>
    %30 = vector.shape_cast %29 : vector<1x4x16xf32> to vector<1x4x16x1xf32>
    %31 = tpu.reciprocal %30 {approx = true} : vector<1x4x16x1xf32> -> vector<1x4x16x1xf32>
    %32 = vector.broadcast %31 : vector<1x4x16x1xf32> to vector<1x4x16x16xf32>
    %33 = arith.mulf %28, %32 : vector<1x4x16x16xf32>
    %34 = vector.shape_cast %33 : vector<1x4x16x16xf32> to vector<4x16x16xf32>
    %35 = arith.truncf %34 : vector<4x16x16xf32> to vector<4x16x16xbf16>
    "tpu.trace_start"() <{level = 10 : i32, message = "nqk,nkd->nqd"}> : () -> ()
    %cst_21 = arith.constant dense<0.000000e+00> : vector<4x16x8xf32>
    %36 = tpu.matmul %35, %17, %cst_21 {dimension_numbers = #tpu.dot_dimension_numbers<[2], [1], [1], [2], [0, 0, 0, 1, 1, 2], [0], [0]>} : vector<4x16x16xbf16>, vector<4x16x8xbf16>, vector<4x16x8xf32> -> vector<4x16x8xf32>
    "tpu.trace_stop"() : () -> ()
    %37 = arith.truncf %36 : vector<4x16x8xf32> to vector<4x16x8xbf16>
    %38 = vector.shape_cast %37 : vector<4x16x8xbf16> to vector<1x4x16x8xbf16>
    %39 = tpu.transpose %38, [0, 2, 1, 3] : vector<1x4x16x8xbf16> -> vector<1x16x4x8xbf16>
    %40 = vector.shape_cast %39 : vector<1x16x4x8xbf16> to vector<16x32xbf16>
    %c0_22 = arith.constant 0 : index
    %c0_23 = arith.constant 0 : index
    %41 = vector.load %arg12[%c0_22, %c0_23] : memref<32x32xbf16, #tpu.memory_space<vmem>>, vector<32x32xbf16>
    %cst_24 = arith.constant dense<0.000000e+00> : vector<16x32xf32>
    %42 = tpu.matmul %40, %41, %cst_24 {dimension_numbers = #tpu.dot_dimension_numbers<[1], [0], [0], [1], [0, 0, 1, 1], [], []>} : vector<16x32xbf16>, vector<32x32xbf16>, vector<16x32xf32> -> vector<16x32xf32>
    %c0_25 = arith.constant 0 : index
    %c0_26 = arith.constant 0 : index
    %43 = vector.load %arg13[%c0_25, %c0_26] : memref<1x32xf32, #tpu.memory_space<vmem>>, vector<1x32xf32>
    %44 = vector.broadcast %43 : vector<1x32xf32> to vector<16x32xf32>
    %45 = arith.addf %42, %44 : vector<16x32xf32>
    %46 = vector.shape_cast %45 : vector<16x32xf32> to vector<1x16x32xf32>
    %c0_27 = arith.constant 0 : index
    %c0_28 = arith.constant 0 : index
    %c0_29 = arith.constant 0 : index
    %47 = vector.load %arg14[%c0_27, %c0_28, %c0_29] : memref<1x16x32xf32, #tpu.memory_space<vmem>>, vector<1x16x32xf32>
    tpu.vector_store %arg14[%c0_27, %c0_28, %c0_29], %46 {strides = array<i32>} : memref<1x16x32xf32, #tpu.memory_space<vmem>>, vector<1x16x32xf32>,
    return
  }
  func.func @transform_0(%arg0: i32, %arg1: i32) -> (i32, i32, i32) {
    %c0_i32 = arith.constant 0 : i32
    %c0_i32_0 = arith.constant 0 : i32
    return %arg0, %arg1, %c0_i32 : i32, i32, i32
  }
  func.func @transform_1(%arg0: i32, %arg1: i32) -> (i32, i32, i32) {
    %c0_i32 = arith.constant 0 : i32
    %c0_i32_0 = arith.constant 0 : i32
    %c0_i32_1 = arith.constant 0 : i32
    return %arg0, %c0_i32, %c0_i32_0 : i32, i32, i32
  }
  func.func @transform_2(%arg0: i32, %arg1: i32) -> (i32, i32, i32) {
    %c0_i32 = arith.constant 0 : i32
    %c0_i32_0 = arith.constant 0 : i32
    %c0_i32_1 = arith.constant 0 : i32
    return %arg0, %c0_i32, %c0_i32_0 : i32, i32, i32
  }
  func.func @transform_3(%arg0: i32, %arg1: i32) -> (i32, i32, i32, i32) {
    %c0_i32 = arith.constant 0 : i32
    %c0_i32_0 = arith.constant 0 : i32
    %c0_i32_1 = arith.constant 0 : i32
    %c0_i32_2 = arith.constant 0 : i32
    return %c0_i32, %c0_i32_0, %arg1, %c0_i32_1 : i32, i32, i32, i32
  }
  func.func @transform_4(%arg0: i32, %arg1: i32) -> (i32, i32) {
    %c0_i32 = arith.constant 0 : i32
    %c0_i32_0 = arith.constant 0 : i32
    %c0_i32_1 = arith.constant 0 : i32
    return %c0_i32, %c0_i32_0 : i32, i32
  }
  func.func @transform_5(%arg0: i32, %arg1: i32) -> (i32, i32) {
    %c0_i32 = arith.constant 0 : i32
    %c0_i32_0 = arith.constant 0 : i32
    %c0_i32_1 = arith.constant 0 : i32
    return %c0_i32, %c0_i32_0 : i32, i32
  }
  func.func @transform_6(%arg0: i32, %arg1: i32) -> (i32, i32) {
    %c0_i32 = arith.constant 0 : i32
    %c0_i32_0 = arith.constant 0 : i32
    %c0_i32_1 = arith.constant 0 : i32
    return %c0_i32, %c0_i32_0 : i32, i32
  }
  func.func @transform_7(%arg0: i32, %arg1: i32) -> (i32, i32) {
    %c0_i32 = arith.constant 0 : i32
    %c0_i32_0 = arith.constant 0 : i32
    %c0_i32_1 = arith.constant 0 : i32
    return %c0_i32, %c0_i32_0 : i32, i32
  }
  func.func @transform_8(%arg0: i32, %arg1: i32) -> (i32, i32) {
    %c0_i32 = arith.constant 0 : i32
    %c0_i32_0 = arith.constant 0 : i32
    %c0_i32_1 = arith.constant 0 : i32
    return %c0_i32, %c0_i32_0 : i32, i32
  }
  func.func @transform_9(%arg0: i32, %arg1: i32) -> (i32, i32) {
    %c0_i32 = arith.constant 0 : i32
    %c0_i32_0 = arith.constant 0 : i32
    %c0_i32_1 = arith.constant 0 : i32
    return %c0_i32, %c0_i32_0 : i32, i32
  }
  func.func @transform_10(%arg0: i32, %arg1: i32) -> (i32, i32) {
    %c0_i32 = arith.constant 0 : i32
    %c0_i32_0 = arith.constant 0 : i32
    %c0_i32_1 = arith.constant 0 : i32
    return %c0_i32, %c0_i32_0 : i32, i32
  }
  func.func @transform_11(%arg0: i32, %arg1: i32) -> (i32, i32) {
    %c0_i32 = arith.constant 0 : i32
    %c0_i32_0 = arith.constant 0 : i32
    %c0_i32_1 = arith.constant 0 : i32
    return %c0_i32, %c0_i32_0 : i32, i32
  }
  func.func @transform_12(%arg0: i32, %arg1: i32) -> (i32, i32, i32) {
    %c0_i32 = arith.constant 0 : i32
    %c0_i32_0 = arith.constant 0 : i32
    return %arg0, %arg1, %c0_i32 : i32, i32, i32
  }
}

</mosaic_0001>

<bundles_post_ra>
// kernel: tpu_custom_call.1
= control target key start
LH: loop header
LB: loop body
LE: loop exit
PB: predicated region body
PF: predicated region fallthrough
CT: control target
= control target key end

     0   :  { %s4108_s0 = inlined_call_operand.hbm [shape: bf16[2,16,32], index: 0, kind: input, shape index: {}]   ;;  %s4109_s1 = inlined_call_operand.hbm [shape: bf16[2,16,32], index: 1, kind: input, shape index: {}]   ;;  %s4110_s2 = inlined_call_operand.hbm [shape: bf16[2,16,32], index: 2, kind: input, shape index: {}]   ;;  %s4111_s3 = inlined_call_operand.hbm [shape: bf16[1,1,16,16], index: 3, kind: input, shape index: {}]   ;;  %s4112_s4 = inlined_call_operand.hbm [shape: bf16[32,32], index: 4, kind: input, shape index: {}]   ;;  %s4113_s5 = inlined_call_operand.vmem [shape: f32[1,32], index: 5, kind: input, shape index: {}]   ;;  %s4114_s6 = inlined_call_operand.vmem [shape: bf16[32,32], index: 6, kind: input, shape index: {}]   ;;  %s4115_s7 = inlined_call_operand.vmem [shape: f32[1,32], index: 7, kind: input, shape index: {}]   ;;  %s4116_s8 = inlined_call_operand.hbm [shape: bf16[32,32], index: 8, kind: input, shape index: {}]   ;;  %s4117_s9 = inlined_call_operand.hbm [shape: f32[1,32], index: 9, kind: input, shape index: {}]   ;;  %s4118_s10 = inlined_call_operand.vmem [shape: bf16[32,32], index: 10, kind: input, shape index: {}]   ;;  %s4119_s11 = inlined_call_operand.vmem [shape: f32[1,32], index: 11, kind: input, shape index: {}]   ;;  %s4120_s12 = inlined_call_operand.hbm [shape: f32[2,16,32], index: 12, kind: output, shape index: {}]  }
   0x1   :  { %4149 = sst [smem:[#allocation30_spill]] %s4109_s1 }
   0x2   :  { %4150 = sst [smem:[#allocation31_spill]] %s4111_s3 }
   0x3   :  { %4151 = sst [smem:[#allocation32_spill]] %s4113_s5 }
   0x4   :  { %4152 = sst [smem:[#allocation33_spill]] %s4114_s6 }
   0x5   :  { %4153 = sst [smem:[#allocation34_spill]] %s4115_s7 }
   0x6   :  { %4154 = sst [smem:[#allocation35_spill]] %s4116_s8 }
   0x7   :  { %4155 = sst [smem:[#allocation36_spill]] %s4118_s10 }
   0x8   :  { %4156 = sst [smem:[#allocation37_spill]] %s4119_s11 }
   0x9   :  { %4157 = sst [smem:[#allocation38_spill]] %s4120_s12 }
   0xa   :  { %17 = vsyncpa [#allocation5], 0 }
   0xb   :  { %19 = vsyncpa [#allocation5 + $0x1], 0 }
   0xc   :  { %20 = vsyncpa [#allocation8], 0 }
   0xd   :  { %22 = vsyncpa [#allocation8 + $0x1], 0 }
   0xe   :  { %23 = vsyncpa [#allocation11], 0 }
   0xf   :  { %24 = vsyncpa [#allocation14], 0 }
  0x10   :  { %25 = vsyncpa [#allocation6], 0 }
  0x11   :  { %27 = vsyncpa [#allocation6 + $0x1], 0  ;;  %s3413_s21 = smov 0   ;;  %s3415_s22 = smov 0  }
  0x12   :  { %s3417_s23 = smov 0   ;;  %s3419_s24 = smov 0  }
  0x13   :  { %s3421_s25 = smov 0   ;;  %s3423_s26 = smov 0  }
  0x14 LB: > { %4158 = sst [smem:[#allocation22_spill]] %s3304_s21  ;;  %s3444_s27 = sadd.s32 4294967295, %s3324_s26   ;;  %s3324_s26 = sphi %s3423_s26, %s33_s26   ;;  %s3320_s25 = sphi %s3421_s25, %s4207_s25   ;;  %s3316_s24 = sphi %s3419_s24, %s4211_s24   ;;  %s3312_s23 = sphi %s3417_s23, %s4210_s23   ;;  %s3308_s22 = sphi %s3415_s22, %s4209_s22   ;;  %s3304_s21 = sphi %s3413_s21, %s4208_s21  }
  0x15   : > { %4159 = sst [smem:[#allocation23_spill]] %s3316_s24  ;;  %s2669_s28 = sadd.s32 4294967294, %s3324_s26  }
  0x16   : > { %4160 = sst [smem:[#allocation24_spill]] %s3320_s25  ;;  %p67_p0 = scmp.ne.s32.totalorder %s3308_s22, %s3304_s21 }
  0x17   : > { %4161 = sst [smem:[#allocation25_spill]] %s3324_s26  ;;  %p4124_p1 = scmp.eq.s32.totalorder %s3444_s27, 0 }
  0x18   : > { %p345_p3 = scmp.eq.s32.totalorder %s2669_s28, 1  ;;  %p2670_p5 = scmp.ge.s32.totalorder %s3324_s26, 1 }
  0x19   : > { %p3453_p4 = por %p4124_p1, %p67_p0  ;;  %p352_p7 = scmp.lt.s32.totalorder %s3324_s26, 3 }
  0x1a   : > { %p3458_p6 = por %p345_p3, %p67_p0  ;;  %s3326_s14 = smov [#allocation10]  }
  0x1b   : > { %s4162_s29 = scalar_select %p3453_p4, 1, 0 }
  0x1c   : > { %s4163_s30 = scalar_select %p3458_p6, 1, 0 }
  0x1d   : > { %p3463_p8 = pnand %p2670_p5, %p352_p7  ;;  %s367_s15 = sshll.u32 %s3326_s14, 4  ;;  %s3467_s15 = int_to_ptr.vmem [resolvable:$true] %s367_s15 }
  0x1e   : > { %4164 = sst [smem:[#allocation26_spill]] %s4163_s30  ;;  %s3327_s17 = smov [#allocation13]  }
  0x1f   : > { %s4165_s13 = scalar_select %p3463_p8, 1, 0 }
  0x20   : > { %p2882_p9 = pneg %p3463_p8  ;;  %s402_s18 = sshll.u32 %s3327_s17, 4  ;;  %s3478_s18 = int_to_ptr.vmem [resolvable:$true] %s402_s18 }
  0x21   : > { %s4167_s3 = sld [smem:[#allocation31_spill]] }
  0x22   : > { %p3474_p11 = pnand %p2882_p9, %p4124_p1 }
  0x24   : > { %s4166_s16 = scalar_select %p3474_p11, 1, 0 }
  0x25   : > { %p3488_p13 = pneg %p3474_p11 }
  0x27   : > { %s3028_s28 = scalar_lea.hbm %s4167_s3, 128 }
  0x28   : > { %p3029_p12 = scmp.ne.s32.totalorder %s4167_s3, %s3028_s28  ;;  %p3035_p5 = scmp.lt.u32.totalorder %s3028_s28, %s4167_s3 }
  0x29   : > { %s4168_s21 = scalar_select %p3488_p13, 1, 0 }
  0x2a   : > { %p3031_p0 = pnand %p3488_p13, %p3029_p12 }
  0x2c   : > { %p3032_p3 = pneg %p3031_p0 }
  0x2e   : > { %p3037_p7 = pnand %p3035_p5, %p3032_p3 }
  0x30   : > { %3040 = shalt.err (!%p3037_p7)
}
  0x31   : > { %s3041_s30 = scalar_lea.vmem %s3467_s15, 128  ;;  %p3049_p2 = scmp.lt.s32.totalorder %s3467_s15, %s3467_s15 }
  0x32   : > { %p3042_p9 = scmp.ne.s32.totalorder %s3467_s15, %s3041_s30  ;;  %p3050_p6 = scmp.lt.s32.totalorder %s3041_s30, %s3041_s30 }
  0x34   : > { %p3044_p10 = pnand %p3042_p9, %p3488_p13  ;;  %p3051_p12 = por %p3050_p6, %p3049_p2 }
  0x36   : > { %p3045_p1 = pneg %p3044_p10 }
  0x38   : > { %p3052_p0 = pnand %p3051_p12, %p3045_p1 }
  0x3a   : > { %3055 = shalt.err (!%p3052_p0)
}
  0x3b   : > { %s4126_s19 = smov 64   ;;  %s4128_s12 = smov 4  }
  0x3c   : > { %2885 = dma.hbm_to_vmem [thread:$0]  (!%p3474_p11), %s4167_s3, 128, %s3467_s15, [#allocation11], %s4126_s19, %s4126_s19, %s4128_s12  }
  0x3d   : > { %s4169_s8 = sld [smem:[#allocation35_spill]] }
  0x43   : > { %s3056_s30 = scalar_lea.hbm %s4169_s8, 256 }
  0x44   : > { %p3057_p1 = scmp.ne.s32.totalorder %s4169_s8, %s3056_s30  ;;  %p3063_p10 = scmp.lt.u32.totalorder %s3056_s30, %s4169_s8 }
  0x46   : > { %p3059_p2 = pnand %p3057_p1, %p3488_p13 }
  0x48   : > { %p3060_p6 = pneg %p3059_p2 }
  0x4a   : > { %p3065_p3 = pnand %p3063_p10, %p3060_p6 }
  0x4c   : > { %3068 = shalt.err (!%p3065_p3)
}
  0x4d   : > { %s3069_s15 = scalar_lea.vmem %s3478_s18, 256  ;;  %p3077_p12 = scmp.lt.s32.totalorder %s3478_s18, %s3478_s18 }
  0x4e   : > { %p3070_p5 = scmp.ne.s32.totalorder %s3478_s18, %s3069_s15  ;;  %p3078_p0 = scmp.lt.s32.totalorder %s3069_s15, %s3069_s15 }
  0x50   : > { %p3072_p7 = pnand %p3070_p5, %p3488_p13  ;;  %p3079_p1 = por %p3078_p0, %p3077_p12 }
  0x52   : > { %p3073_p9 = pneg %p3072_p7 }
  0x54   : > { %p3080_p2 = pnand %p3079_p1, %p3073_p9 }
  0x56   : > { %3083 = shalt.err (!%p3080_p2)
}
  0x57   : > { %2891 = dma.hbm_to_vmem [thread:$0]  (!%p3474_p11), %s4169_s8, 256, %s3478_s18, [#allocation14], %s4126_s19, %s4126_s19, %s4128_s12  }
  0x58   : > { %s45_s11 = sadd.s32 1, %s3320_s25  ;;  %s54_s24 = sadd.s32 1, %s3312_s23 }
  0x59   : > { %p47_p6 = scmp.ge.s32.totalorder %s45_s11, 2  ;;  %p61_p10 = scmp.ne.s32.totalorder %s3312_s23, %s3308_s22 }
  0x5a   : > { %p62_p3 = scmp.eq.s32.totalorder %s3324_s26, 0  ;;  %p2913_p5 = scmp.lt.s32.totalorder %s3324_s26, 2 }
  0x5b   : > { %s4213_s11 = smov (%p47_p6, %s45_s11), 0  ;;  %p4171_p9 = scmp.eq.s32.totalorder %s3444_s27, 1 }
  0x5c   : > { %4170 = sst [smem:[#allocation27_spill]] %s4213_s11  ;;  %p63_p7 = por %p62_p3, %p61_p10 }
  0x5d   : > { %p3548_p12 = por %p4171_p9, %p61_p10  ;;  %s49_s28 = ssub.s32 %s3320_s25, %s4213_s11 }
  0x5e   : > { %s4130_s14 = sand.u32 1, %s3312_s23   ;;  %p52_p0 = scmp.eq.s32.totalorder %s49_s28, 0 }
  0x5f   : > { %s4172_s20 = scalar_select %p3548_p12, 1, 0 }
  0x60   : > { %s3557_s18 = sshll.u32 %s4130_s14, 3  ;;  %s3560_s17 = sshll.u32 %s3320_s25, 7 }
  0x61   : > { %4173 = sst [smem:[#allocation28_spill]] %s4172_s20  ;;  %p3562_p1 = pnand %p2913_p5, %p63_p7 }
  0x62   : > { %s3567_s15 = scalar_select %p52_p0, %s3312_s23, %s54_s24  }
  0x63   : > { %s4174_s30 = scalar_select %p3562_p1, 1, 0 }
  0x64   : > { %4175 = sst [smem:[#allocation29_spill]] %s3567_s15  ;;  %s456_s5 = sand.u32 1, %s3324_s26  }
  0x65   : > { %s4176_s1 = sld [smem:[#allocation30_spill]]  ;;  %s460_s28 = scalar_lea.vmem [#allocation7], %s3557_s18 }
  0x66   : > { %s467_s14 = sshll.u32 %s460_s28, 4  ;;  %s3579_s3 = scalar_lea.sflag [#allocation8], %s456_s5  ;;  %s3577_s14 = int_to_ptr.vmem [resolvable:$true] %s467_s14 }
  0x67   : > { %p3585_p6 = pneg %p3562_p1 }
  0x69   : > { %s4177_s24 = scalar_select %p3585_p6, 1, 0 }
  0x6b   : > { %s3574_s12 = scalar_lea.hbm %s4176_s1, %s3560_s17  ;;  %s3089_s11 = scalar_lea.hbm %s4176_s1, 256 }
  0x6c   : > { %s3084_s8 = scalar_lea.hbm %s3574_s12, 128  ;;  %p3090_p5 = scmp.lt.u32.totalorder %s3574_s12, %s4176_s1 }
  0x6d   : > { %p3085_p2 = scmp.ne.s32.totalorder %s3574_s12, %s3084_s8  ;;  %p3091_p7 = scmp.lt.u32.totalorder %s3089_s11, %s3084_s8 }
  0x6e   : > { %p3093_p0 = scmp.lt.u32.totalorder %s3084_s8, %s3574_s12 }
  0x6f   : > { %p3087_p10 = pnand %p3585_p6, %p3085_p2  ;;  %p3092_p9 = por %p3091_p7, %p3090_p5 }
  0x71   : > { %p3088_p3 = pneg %p3087_p10  ;;  %p3094_p12 = por %p3093_p0, %p3092_p9 }
  0x73   : > { %p3095_p4 = pnand %p3094_p12, %p3088_p3 }
  0x75   : > { %3098 = shalt.err (!%p3095_p4)
}
  0x76   : > { %s3099_s5 = scalar_lea.vmem %s3577_s14, 128  ;;  %s3330_s19 = smov [#allocation7]  }
  0x77   : > { %p3100_p2 = scmp.ne.s32.totalorder %s3577_s14, %s3099_s5  ;;  %s3104_s10 = sshll.u32 %s3330_s19, 4  ;;  %s3105_s10 = int_to_ptr.vmem [resolvable:$false] %s3104_s10 }
  0x78   : > { %s3106_s25 = scalar_lea.vmem %s3105_s10, 256  ;;  %p3107_p11 = scmp.lt.s32.totalorder %s3577_s14, %s3105_s10 }
  0x79   : > { %p3102_p10 = pnand %p3100_p2, %p3585_p6  ;;  %p3108_p13 = scmp.lt.s32.totalorder %s3106_s25, %s3099_s5 }
  0x7b   : > { %p3103_p8 = pneg %p3102_p10  ;;  %p3109_p5 = por %p3108_p13, %p3107_p11 }
  0x7d   : > { %p3110_p7 = pnand %p3109_p5, %p3103_p8 }
  0x7f   : > { %3113 = shalt.err (!%p3110_p7)
}
  0x80   : > { %s4178_s8 = smov 4   ;;  %s4179_s11 = smov 64  }
  0x81   : > { %2901 = dma.hbm_to_vmem [thread:$0]  (!%p3562_p1), %s3574_s12, 128, %s3577_s14, %s3579_s3, %s4179_s11, %s4179_s11, %s4178_s8  }
  0x82   : > { %s3331_s28 = smov [#allocation12]   ;;  %s3332_s19 = smov [#allocation15]  }
  0x83   : > { %s380_s1 = sshll.u32 %s3331_s28, 4  ;;  %s416_s15 = sshll.u32 %s3332_s19, 4  ;;  %s381_s1 = int_to_ptr.vmem [resolvable:$true] %s380_s1  ;;  %s417_s15 = int_to_ptr.vmem [resolvable:$true] %s416_s15 }
  0x84   : > { %s3114_s25 = scalar_lea.hbm %s4112_s4, 256  ;;  %p4180_p8 = scmp.ne.s32.totalorder %s4168_s21, 0 }
  0x85   : > { %p3115_p4 = scmp.ne.s32.totalorder %s4112_s4, %s3114_s25  ;;  %p3121_p12 = scmp.lt.u32.totalorder %s3114_s25, %s4112_s4 }
  0x87   : > { %p3117_p11 = pnand %p3115_p4, %p4180_p8 }
  0x89   : > { %p3118_p13 = pneg %p3117_p11 }
  0x8b   : > { %p3123_p3 = pnand %p3121_p12, %p3118_p13 }
  0x8d   : > { %3126 = shalt.err (!%p3123_p3)
}
  0x8e   : > { %s3127_s12 = scalar_lea.vmem %s381_s1, 256  ;;  %p3135_p10 = scmp.lt.s32.totalorder %s381_s1, %s381_s1 }
  0x8f   : > { %p3128_p9 = scmp.ne.s32.totalorder %s381_s1, %s3127_s12  ;;  %p3136_p5 = scmp.lt.s32.totalorder %s3127_s12, %s3127_s12 }
  0x91   : > { %p3130_p0 = pnand %p3128_p9, %p4180_p8  ;;  %p3137_p7 = por %p3136_p5, %p3135_p10 }
  0x93   : > { %p3131_p2 = pneg %p3130_p0 }
  0x95   : > { %p3138_p1 = pnand %p3137_p7, %p3131_p2 }
  0x97   : > { %3141 = shalt.err (!%p3138_p1)
}
  0x98   : > { %p4181_p4 = scmp.ne.s32.totalorder %s4166_s16, 0  ;;  %s3142_s14 = scalar_lea.hbm %s4117_s9, 16 }
  0x99   : > { %p3143_p11 = scmp.ne.s32.totalorder %s4117_s9, %s3142_s14  ;;  %p3149_p12 = scmp.lt.u32.totalorder %s3142_s14, %s4117_s9 }
  0x9a   : > { %2888 = dma.hbm_to_vmem [thread:$0]  (!%p4181_p4), %s4112_s4, 256, %s381_s1, [#allocation11], %s4179_s11, %s4179_s11, %s4178_s8  }
  0x9b   : > { %p3145_p1 = pnand %p3143_p11, %p4180_p8 }
  0x9d   : > { %p3146_p13 = pneg %p3145_p1 }
  0x9f   : > { %p3151_p3 = pnand %p3149_p12, %p3146_p13 }
  0xa1   : > { %3154 = shalt.err (!%p3151_p3)
}
  0xa2   : > { %s3155_s25 = scalar_lea.vmem %s417_s15, 16  ;;  %s3162_s1 = scalar_lea.vmem %s417_s15, 32 }
  0xa3   : > { %p3156_p9 = scmp.ne.s32.totalorder %s417_s15, %s3155_s25  ;;  %p3163_p10 = scmp.lt.s32.totalorder %s417_s15, %s417_s15 }
  0xa4   : > { %p3164_p5 = scmp.lt.s32.totalorder %s3162_s1, %s3155_s25 }
  0xa5   : > { %p3158_p0 = pnand %p3156_p9, %p4180_p8 }
  0xa6   : > { %p3165_p7 = por %p3164_p5, %p3163_p10 }
  0xa7   : > { %p3159_p2 = pneg %p3158_p0 }
  0xa9   : > { %p3166_p6 = pnand %p3165_p7, %p3159_p2 }
  0xab   : > { %3169 = shalt.err (!%p3166_p6)
}
  0xac   : > { %2894 = dma.hbm_to_vmem [thread:$0]  (!%p4181_p4), %s4117_s9, 16, %s417_s15, [#allocation14]  }
  0xad   : > { %s3655_s26 = scalar_lea.hbm %s4108_s0, %s3560_s17  ;;  %s437_s20 = scalar_lea.vmem [#allocation4], %s3557_s18 }
  0xae   : > { %s446_s16 = sshll.u32 %s437_s20, 4  ;;  %s3664_s19 = scalar_lea.hbm %s4110_s2, %s3560_s17  ;;  %s3658_s16 = int_to_ptr.vmem [resolvable:$true] %s446_s16 }
  0xaf   : > { %s4182_s10 = sand.u32 1, %s3312_s23   ;;  %s3170_s5 = scalar_lea.hbm %s3655_s26, 128 }
  0xb0   : > { %s3668_s15 = scalar_lea.sflag [#allocation5], %s4182_s10  ;;  %p3171_p6 = scmp.ne.s32.totalorder %s3655_s26, %s3170_s5 }
  0xb1   : > { %p4183_p8 = scmp.ne.s32.totalorder %s4177_s24, 0  ;;  %s3175_s12 = scalar_lea.hbm %s4108_s0, 256 }
  0xb2   : > { %p3176_p1 = scmp.lt.u32.totalorder %s3655_s26, %s4108_s0  ;;  %p3177_p13 = scmp.lt.u32.totalorder %s3175_s12, %s3170_s5 }
  0xb3   : > { %p3173_p4 = pnand %p3171_p6, %p4183_p8  ;;  %p3179_p3 = scmp.lt.u32.totalorder %s3170_s5, %s3655_s26 }
  0xb4   : > { %p3178_p12 = por %p3177_p13, %p3176_p1 }
  0xb5   : > { %p3174_p11 = pneg %p3173_p4 }
  0xb6   : > { %p3180_p9 = por %p3179_p3, %p3178_p12 }
  0xb8   : > { %p3181_p0 = pnand %p3180_p9, %p3174_p11 }
  0xba   : > { %3184 = shalt.err (!%p3181_p0)
}
  0xbb   : > { %s3185_s17 = scalar_lea.vmem %s3658_s16, 128  ;;  %s3333_s7 = smov [#allocation4]  }
  0xbc   : > { %p3186_p2 = scmp.ne.s32.totalorder %s3658_s16, %s3185_s17  ;;  %s3190_s20 = sshll.u32 %s3333_s7, 4  ;;  %s3191_s20 = int_to_ptr.vmem [resolvable:$false] %s3190_s20 }
  0xbd   : > { %s3192_s14 = scalar_lea.vmem %s3191_s20, 256  ;;  %p3193_p7 = scmp.lt.s32.totalorder %s3658_s16, %s3191_s20 }
  0xbe   : > { %p3188_p10 = pnand %p3186_p2, %p4183_p8  ;;  %p3194_p6 = scmp.lt.s32.totalorder %s3192_s14, %s3185_s17 }
  0xc0   : > { %p3189_p5 = pneg %p3188_p10  ;;  %p3195_p4 = por %p3194_p6, %p3193_p7 }
  0xc2   : > { %p3196_p1 = pnand %p3195_p4, %p3189_p5 }
  0xc4   : > { %3199 = shalt.err (!%p3196_p1)
}
  0xc5   : > { %p4184_p11 = scmp.ne.s32.totalorder %s4174_s30, 0  ;;  %s481_s28 = scalar_lea.vmem [#allocation9], %s3557_s18 }
  0xc6   : > { %s488_s10 = sshll.u32 %s481_s28, 4  ;;  %s3200_s5 = scalar_lea.hbm %s3664_s19, 128  ;;  %s3696_s10 = int_to_ptr.vmem [resolvable:$true] %s488_s10 }
  0xc7   : > { %2898 = dma.hbm_to_vmem [thread:$0]  (!%p4184_p11), %s3655_s26, 128, %s3658_s16, %s3668_s15, %s4179_s11, %s4179_s11, %s4178_s8  }
  0xc8   : > { %p3201_p13 = scmp.ne.s32.totalorder %s3664_s19, %s3200_s5  ;;  %s3205_s12 = scalar_lea.hbm %s4110_s2, 256 }
  0xc9   : > { %p3206_p9 = scmp.lt.u32.totalorder %s3664_s19, %s4110_s2  ;;  %p3207_p0 = scmp.lt.u32.totalorder %s3205_s12, %s3200_s5 }
  0xca   : > { %p3203_p12 = pnand %p3201_p13, %p4183_p8  ;;  %p3209_p10 = scmp.lt.u32.totalorder %s3200_s5, %s3664_s19 }
  0xcb   : > { %p3208_p2 = por %p3207_p0, %p3206_p9 }
  0xcc   : > { %p3204_p3 = pneg %p3203_p12 }
  0xcd   : > { %p3210_p5 = por %p3209_p10, %p3208_p2 }
  0xcf   : > { %p3211_p7 = pnand %p3210_p5, %p3204_p3 }
  0xd1   : > { %3214 = shalt.err (!%p3211_p7)
}
  0xd2   : > { %s3215_s18 = scalar_lea.vmem %s3696_s10, 128  ;;  %s3334_s26 = smov [#allocation9]  }
  0xd3   : > { %p3216_p6 = scmp.ne.s32.totalorder %s3696_s10, %s3215_s18  ;;  %s3220_s16 = sshll.u32 %s3334_s26, 4  ;;  %s3221_s16 = int_to_ptr.vmem [resolvable:$false] %s3220_s16 }
  0xd4   : > { %s3222_s15 = scalar_lea.vmem %s3221_s16, 256  ;;  %p3223_p13 = scmp.lt.s32.totalorder %s3696_s10, %s3221_s16 }
  0xd5   : > { %p3218_p4 = pnand %p3216_p6, %p4183_p8  ;;  %p3224_p12 = scmp.lt.s32.totalorder %s3222_s15, %s3215_s18 }
  0xd7   : > { %p3219_p1 = pneg %p3218_p4  ;;  %p3225_p9 = por %p3224_p12, %p3223_p13 }
  0xd9   : > { %p3226_p0 = pnand %p3225_p9, %p3219_p1 }
  0xdb   : > { %3229 = shalt.err (!%p3226_p0)
}
  0xdc   : > { %2904 = dma.hbm_to_vmem [thread:$0]  (!%p4184_p11), %s3664_s19, 128, %s3696_s10, %s3579_s3, %s4179_s11, %s4179_s11, %s4178_s8  }
  0xdd   : > { %p4185_p8 = scmp.ne.s32.totalorder %s4165_s13, 0 }
  0xde   : > { %s3726_s24 = sand.u32 (!%p4185_p8), 1, %s3308_s22   ;;  %p4186_p3 = scmp.ne.s32.totalorder (!%p4185_p8), %s4162_s29, 0 }
  0xdf   : > { %500 = sbr.rel (%p4185_p8) target bundleno = 1776 (0x6f0), region = 68  ;;  %s3729_s17 = sshll.u32 (!%p4185_p8), %s3726_s24, 3 }
  0xe0   : > { %s503_s30 = scalar_lea.sflag (!%p4185_p8), [#allocation5], %s3726_s24  ;;  %s506_s7 = scalar_lea.vmem (!%p4185_p8), [#allocation4], %s3729_s17 }
  0xe6   : > { %3283 = dma.done.wait (%p4186_p3), %s503_s30, 128  }
  0xe7   : > { %3285 = vsyncadd (%p4186_p3), %s503_s30, 4294967168  ;;  %s511_s3 = sand.u32 1, %s3444_s27   ;;  %s515_s8 = scalar_lea.vmem [#allocation7], %s3729_s17 }
  0xe8   : > { %s512_s13 = scalar_lea.sflag [#allocation8], %s511_s3 }
  0xe9   : > { %3287 = dma.done.wait (%p4186_p3), %s512_s13, 256  }
  0xea   : > { %3289 = vsyncadd (%p4186_p3), %s512_s13, 4294967040  ;;  %s524_s11 = scalar_lea.vmem [#allocation9], %s3729_s17  ;;  %p4187_p11 = scmp.eq.s32.totalorder %s3444_s27, 0 }
  0xec   : > { %3291 = dma.done.wait (%p4187_p11), [#allocation11], 384   ;;  %p4188_p2 = pmov %p4187_p11 }
  0xee   : > { %3293 = vsyncadd (%p4188_p2), [#allocation11], 4294966912  ;;  %p4189_p10 = pmov %p4188_p2 }
  0xef   : > { %p4190_p5 = pmov %p4188_p2 }
  0xf0   : > { %3295 = dma.done.wait (%p4189_p10), [#allocation14], 272  }
  0xf1   : > { %3297 = vsyncadd (%p4190_p5), [#allocation14], 4294967024  ;;  %v3335_v0 = vmov 0.0   ;;  %vm3336_vm0 = vmmov 0   ;;  %s4191_s20 = sld [smem:[#allocation33_spill]]  ;;  %v2987_v3 = vld [vmem:[%s515_s8] sm:$0xff]   ;;  %v783_v30 = vlaneseq }
  0xf2   : > { %2778 = vmatprep.subr.bf16.mxu0 %v3335_v0  ;;  %2782 = vmatprep.mubr.msk.bf16.mxu0 %vm3336_vm0, %v3335_v0  ;;  %vm629_vm1 = vcmask 261120   ;;  %v2988_v4 = vld [vmem:[#allocation12] sm:$0xff]   ;;  %v2989_v5 = vld [vmem:[#allocation12 + $0x8] sm:$0xff]   ;;  %s4192_s5 = sld [smem:[#allocation34_spill]]  ;;  %s4193_s12 = sld [smem:[#allocation32_spill]]  ;;  %v2991_v25 = vld [vmem:[#allocation13] sm:$0xff]  }
  0xf3   : > { %2786 = vmatprep.subr.bf16.mxu1 %v3335_v0  ;;  %2790 = vmatprep.mubr.msk.bf16.mxu1 %vm3336_vm0, %v3335_v0  ;;  %v2990_v6 = vld [vmem:[%s506_s7] sm:$0xff]   ;;  %s3337_s6 = smov 104   ;;  %s3338_s21 = smov 120   ;;  %v2992_v26 = vld [vmem:[#allocation13 + $0x8] sm:$0xff]   ;;  %v3340_v28 = vmov 1983009808  }
  0xf4   : > { %s3339_s18 = smov 112   ;;  %2787 = vmatpush3.bf16.msra.mxu1 %v2991_v25  ;;  %v2993_v27 = vld [vmem:[%s524_s11] sm:$0xff]   ;;  %v781_v29 = vunpack.c.l.s4 %v3340_v28  ;;  %v784_v32 = vshrl.u32 %v783_v30, 7  ;;  %v3341_v33 = vmov 1934713408   ;;  %v3342_v36 = vmov 0  }
  0xf5   : > { %2788 = vmatprep.subr.bf16.mxu1 %v3335_v0  ;;  %v812_v34 = vunpack.c.l.s4 %v3341_v33  ;;  %v3800_v37 = vpack.i.b16 %v3342_v36, %v3342_v36  ;;  %vm1027_vm2 = vcmask 64512   ;;  %vm1867_vm3 = vcmask 130048   ;;  %s4194_s15 = sld [smem:[#allocation36_spill]]  ;;  %s3343_s7 = smov 16  }
  0xf6   : > { %v782_v31 = vunpack.c.0.s8 %v781_v29  ;;  %s3344_s3 = smov 8   ;;  %s4195_s13 = sld [smem:[#allocation23_spill]]  ;;  %vm2411_vm4 = vcmask 195584  }
  0xf7   : > { %v2985_v1 = vld [vmem:[%s4191_s20] sm:$0xff]   ;;  %v2986_v2 = vld [vmem:[%s4191_s20 + $0x8] sm:$0xff]   ;;  %v813_v44 = vunpack.c.0.s8 %v812_v34  ;;  %s3345_s8 = smov 24   ;;  %s2693_s11 = sshll.u32 %s3726_s24, 4 }
  0xf8   : > { %2779 = vmatpush3.bf16.msra.mxu0 %v2985_v1  ;;  %v2694_v7 = vld [vmem:[%s4192_s5] ss:$0 sm:$0xff]  ;;  %2789 = vmatpush3.bf16.msra.mxu1 %v2992_v26  ;;  %v3802_v42 = vsub.s32 %v782_v31, %v784_v32  ;;  %s4196_s27 = sld [smem:[#allocation37_spill]]  ;;  %s590_s14 = scalar_lea.vmem [#allocation16], %s2693_s11 }
  0xf9   : > { %2780 = vmatprep.subr.bf16.mxu0 %v3335_v0  ;;  %v2712_v15 = vld [vmem:[%s4193_s12] ss:$0 sm:$0xff]  ;;  %2802 = vmatprep.subr.bf16.mxu1 %v3335_v0  ;;  %v3807_v52 = vsub.s32 %v813_v44, %v784_v32  ;;  %s4197_s28 = sld [smem:[#allocation28_spill]]  ;;  %s2498_s10 = sshll.u32 %s590_s14, 4  ;;  %s4051_s10 = int_to_ptr.vmem [resolvable:$true] %s2498_s10 }
  0xfa   : > { %s4198_s12 = sld [smem:[#allocation38_spill]]  ;;  %s3346_s26 = smov [#allocation16]  }
  0xfb   : > { %2791 = vmatmul.mubr.msk.bf16.vlgmr.msra.gmra.mrb[0].mxu1 %vm629_vm1, %v2993_v27  ;;  %s3234_s16 = sshll.u32 %s3346_s26, 4  ;;  %s3235_s16 = int_to_ptr.vmem [resolvable:$false] %s3234_s16 }
  0xfc   : > { %2781 = vmatpush3.bf16.msra.mxu0 %v2986_v2  ;;  %2804 = vmatprep.mubr.msk.bf16.mxu1 %vm3336_vm0, %v3335_v0  ;;  %s2745_s5 = sshll.u32 %s4195_s13, 8  ;;  %s3236_s17 = scalar_lea.vmem %s3235_s16, 512 }
  0xfd   : > { %2794 = vmatprep.subr.bf16.mxu0 %v3335_v0  ;;  %p3237_p13 = scmp.lt.s32.totalorder %s4051_s10, %s3235_s16 }
  0xff   : > { %2783 = vmatmul.mubr.msk.bf16.vlgmr.msra.gmra.mrb[0].mxu0 %vm629_vm1, %v2987_v3  ;;  %p4199_p6 = scmp.ne.s32.totalorder %s4197_s28, 0 }
 0x100   : > { %2795 = vmatpush3.bf16.msra.mxu0 %v2988_v4  ;;  %2798 = vmatprep.mubr.msk.bf16.mxu0 %vm3336_vm0, %v3335_v0 }
 0x101   : > { %2796 = vmatprep.subr.bf16.mxu0 %v3335_v0 }
 0x104   : > { %2797 = vmatpush3.bf16.msra.mxu0 %v2989_v5 }
 0x105   : > { %2808 = vmatprep.subr.bf16.mxu0 %v3335_v0 }
 0x107   : > { %2799 = vmatmul.mubr.msk.bf16.vlgmr.msra.gmra.mrb[4].mxu0 %vm629_vm1, %v2990_v6 }
 0x108   : > { %2810 = vmatprep.mubr.msk.bf16.mxu0 %vm3336_vm0, %v3335_v0 }
 0x1d2   : > { %v667_v8 = vpop.f32.mrb[0].mxu0 }
 0x1d3   : > { %v2784_v9 = vpop.f32.mrb[1].mxu0  ;;  %v668_v11 = vadd.f32 %v2694_v7, %v667_v8 }
 0x1d4   : > { %v670_v10 = vpop.f32.mrb[2].mxu0 }
 0x1d5   : > { %v671_v12 = vadd.f32 %v2694_v7, %v670_v10  ;;  %v2785_v13 = vpop.f32.mrb[3].mxu0 }
 0x1d7   : > { %v674_v14 = vpack.c.bf16 %v671_v12, %v668_v11 }
 0x1d9   : > { %755 = vrot.lane.b32.xlu1 %v674_v14, %s3337_s6  ;;  %751 = vrot.lane.b32.xlu0 %v674_v14, %s3338_s21  ;;  %v761_v39 = vshrl.u32 %v674_v14, 16 }
 0x1da   : > { %v1375_v16 = vpop.f32.mrb[4].mxu0 }
 0x1db   : > { %v1376_v17 = vadd.f32 %v2712_v15, %v1375_v16  ;;  %v2800_v18 = vpop.f32.mrb[5].mxu0 }
 0x1dc   : > { %v1378_v19 = vpop.f32.mrb[6].mxu0 }
 0x1dd   : > { %v1382_v20 = vmul.f32 0.35355338, %v1376_v17  ;;  %v1379_v21 = vadd.f32 %v2712_v15, %v1378_v19  ;;  %753 = vrot.lane.b32.xlu0 %v674_v14, %s3339_s18  ;;  %v2801_v22 = vpop.f32.mrb[7].mxu0 }
 0x1df   : > { %v1383_v23 = vmul.f32 0.35355338, %v1379_v21 }
 0x1e1   : > { %v3785_v24 = vpack.c.bf16 %v1383_v23, %v1382_v20 }
 0x1e3   : > { %1386 = vrot.lane.b32.xlu1 %v3785_v24, %s3338_s21  ;;  %1388 = vrot.lane.b32.xlu0 %v3785_v24, %s3339_s18  ;;  %v1396_v56 = vshrl.u32 %v3785_v24, 16 }
 0x1e7   : > { %1390 = vrot.lane.b32.xlu1 %v3785_v24, %s3337_s6 }
 0x24b   : > { %v752_v35 = vpop.permute.xlu0 %751  ;;  %v756_v41 = vpop.permute.xlu1 %755 }
 0x24c   : > { %v759_v38 = vpack.i.b16 %v752_v35, %v674_v14  ;;  %v762_v40 = vshrl.u32 %v752_v35, 16  ;;  %v770_v48 = vshrl.u32 %v756_v41, 16 }
 0x24e   : > { %v763_v43 = vpack.i.b16 %v762_v40, %v761_v39  ;;  %v779_v46 = vcombine.high %v759_v38, %v3800_v37  ;;  %v786_v51 = vrot.slane %v759_v38, %v3802_v42 }
 0x24f   : > { %v754_v45 = vpop.permute.xlu0 %753 }
 0x250   : > { %v767_v47 = vpack.i.b16 %v756_v41, %v754_v45  ;;  %v845_v49 = vcombine.high %v763_v43, %v3800_v37  ;;  %v769_v50 = vshrl.u32 %v754_v45, 16  ;;  %v793_v57 = vrot.slane %v779_v46, %v3802_v42 }
 0x251   : > { %v852_v61 = vrot.slane %v763_v43, %v3802_v42 }
 0x252   : > { %v794_v53 = vcombine.high %v767_v47, %v3800_v37  ;;  %v801_v54 = vrot.slane %v767_v47, %v3802_v42  ;;  %v771_v55 = vpack.i.b16 %v770_v48, %v769_v50  ;;  %v859_v62 = vrot.slane %v845_v49, %v3802_v42 }
 0x254   : > { %v808_v58 = vrot.slane %v794_v53, %v3802_v42  ;;  %v809_v59 = vcombine.low %v786_v51, %v801_v54  ;;  %v810_v60 = vcombine.high %v786_v51, %v801_v54  ;;  %v860_v63 = vcombine.high %v771_v55, %v3800_v37 }
 0x255   : > { %v867_v1 = vrot.slane %v771_v55, %v3802_v42  ;;  %v1387_v2 = vpop.permute.xlu1 %1386  ;;  %v1389_v39 = vpop.permute.xlu0 %1388 }
 0x256   : > { %v817_v3 = vrot.slane %v809_v59, %v3807_v52  ;;  %v824_v4 = vrot.slane %v810_v60, %v3807_v52  ;;  %v825_v5 = vcombine.low %v793_v57, %v808_v58  ;;  %v826_v6 = vcombine.high %v793_v57, %v808_v58 }
 0x257   : > { %v874_v7 = vrot.slane %v860_v63, %v3802_v42  ;;  %v875_v8 = vcombine.low %v852_v61, %v867_v1  ;;  %v876_v9 = vcombine.high %v852_v61, %v867_v1  ;;  %v1394_v10 = vpack.i.b16 %v1387_v2, %v3785_v24 }
 0x258   : > { %v833_v11 = vrot.slane %v825_v5, %v3807_v52  ;;  %v840_v12 = vrot.slane %v826_v6, %v3807_v52  ;;  %v911_v13 = vcombine.low %v817_v3, %v824_v4  ;;  %v2704_v14 = vcombine.high %v817_v3, %v824_v4 }
 0x259   : > { %v883_v15 = vrot.slane %v875_v8, %v3807_v52  ;;  %v890_v16 = vrot.slane %v876_v9, %v3807_v52  ;;  %v891_v17 = vcombine.low %v859_v62, %v874_v7  ;;  %v892_v18 = vcombine.high %v859_v62, %v874_v7  ;;  %v1391_v40 = vpop.permute.xlu1 %1390 }
 0x25a   : > { %v918_v19 = vrot.slane %v911_v13, %v3802_v42  ;;  %v926_v20 = vrot.slane %v2704_v14, %v3802_v42  ;;  %v927_v21 = vcombine.low %v833_v11, %v840_v12  ;;  %v2705_v22 = vcombine.high %v833_v11, %v840_v12 }
 0x25b   : > { %v899_v23 = vrot.slane %v891_v17, %v3807_v52  ;;  %v906_v24 = vrot.slane %v892_v18, %v3807_v52  ;;  %v961_v25 = vcombine.low %v883_v15, %v890_v16  ;;  %v2706_v26 = vcombine.high %v883_v15, %v890_v16 }
 0x25c   : > { %v934_v27 = vrot.slane %v927_v21, %v3802_v42  ;;  %v942_v28 = vrot.slane %v2705_v22, %v3802_v42  ;;  %v943_v29 = vcombine.low %v918_v19, %v926_v20  ;;  %v1397_v30 = vshrl.u32 %v1387_v2, 16 }
 0x25d   : > { %v968_v31 = vrot.slane %v961_v25, %v3802_v42  ;;  %v976_v32 = vrot.slane %v2706_v26, %v3802_v42  ;;  %v977_v33 = vcombine.low %v899_v23, %v906_v24  ;;  %v2707_v34 = vcombine.high %v899_v23, %v906_v24 }
 0x25e   : > { %v951_v35 = vcombine.low %v934_v27, %v942_v28  ;;  %v1398_v36 = vpack.i.b16 %v1397_v30, %v1396_v56  ;;  %v1414_v38 = vcombine.high %v1394_v10, %v3800_v37  ;;  %v950_v45 = vrot.slane %v943_v29, %v3807_v52 }
 0x25f   : > { %v984_v41 = vrot.slane %v977_v33, %v3802_v42  ;;  %v992_v43 = vrot.slane %v2707_v34, %v3802_v42  ;;  %v993_v44 = vcombine.low %v968_v31, %v976_v32  ;;  %v1421_v49 = vrot.slane %v1394_v10, %v3802_v42 }
 0x260   : > { %v958_v46 = vrot.slane %v951_v35, %v3807_v52  ;;  %v1480_v47 = vcombine.high %v1398_v36, %v3800_v37  ;;  %v1404_v50 = vshrl.u32 %v1389_v39, 16  ;;  %v1402_v51 = vpack.i.b16 %v1391_v40, %v1389_v39 }
 0x261   : > { %v1001_v48 = vcombine.low %v984_v41, %v992_v43  ;;  %v1428_v55 = vrot.slane %v1414_v38, %v3802_v42  ;;  %v1405_v56 = vshrl.u32 %v1391_v40, 16  ;;  %v1000_v57 = vrot.slane %v993_v44, %v3807_v52 }
 0x262   : > { %v959_v53 = vcombine.low %v950_v45, %v958_v46  ;;  %v960_v54 = vcombine.high %v950_v45, %v958_v46  ;;  %v1429_v59 = vcombine.high %v1402_v51, %v3800_v37  ;;  %v1436_v60 = vrot.slane %v1402_v51, %v3802_v42 }
 0x263   : > { %v1008_v58 = vrot.slane %v1001_v48, %v3807_v52  ;;  %v1487_v62 = vrot.slane %v1398_v36, %v3802_v42  ;;  %v1494_v63 = vrot.slane %v1480_v47, %v3802_v42  ;;  %v1406_v1 = vpack.i.b16 %v1405_v56, %v1404_v50 }
 0x264   : > { %v1015_v61 = vshrl.u32 %v959_v53, 16  ;;  %v1443_v4 = vrot.slane %v1429_v59, %v3802_v42  ;;  %v1444_v5 = vcombine.low %v1421_v49, %v1436_v60  ;;  %v1023_v6 = vshrl.u32 %v960_v54, 16 }
 0x265   : > { %v1009_v2 = vcombine.low %v1000_v57, %v1008_v58  ;;  %v1010_v3 = vcombine.high %v1000_v57, %v1008_v58  ;;  %v1445_v7 = vcombine.high %v1421_v49, %v1436_v60  ;;  %v1495_v8 = vcombine.high %v1406_v1, %v3800_v37 }
 0x266   : > { %v1502_v9 = vrot.slane %v1406_v1, %v3802_v42  ;;  %v1452_v14 = vrot.slane %v1444_v5, %v3807_v52  ;;  %v1460_v16 = vcombine.low %v1428_v55, %v1443_v4  ;;  %v1461_v17 = vcombine.high %v1428_v55, %v1443_v4 }
 0x267   : > { %v1013_v10 = vpack.i.b16 %v1009_v2, %v959_v53  ;;  %v1016_v11 = vshrl.u32 %v1009_v2, 16  ;;  %v1021_v12 = vpack.i.b16 %v1010_v3, %v960_v54  ;;  %v1024_v13 = vshrl.u32 %v1010_v3, 16 }
 0x268   : > { %v1459_v15 = vrot.slane %v1445_v7, %v3807_v52  ;;  %v1509_v20 = vrot.slane %v1495_v8, %v3802_v42  ;;  %v1510_v21 = vcombine.low %v1487_v62, %v1502_v9  ;;  %v1468_v22 = vrot.slane %v1460_v16, %v3807_v52  ;;  %v742_v16 = vpop.f32.mrb[0].mxu1 }
 0x269   : > { %v1017_v18 = vpack.i.b16 %v1016_v11, %v1015_v61  ;;  %v1025_v19 = vpack.i.b16 %v1024_v13, %v1023_v6  ;;  %1028 = vst.msk [vmem:[#allocation2] sm:$0xff] %vm1027_vm2, %v1013_v10  ;;  %1030 = vst.msk [vmem:[#allocation2 + $0x10] sm:$0xff] %vm1027_vm2, %v1021_v12  ;;  %v1475_v23 = vrot.slane %v1461_v17, %v3807_v52 }
 0x26a   : > { %v1511_v24 = vcombine.high %v1487_v62, %v1502_v9  ;;  %v1546_v25 = vcombine.low %v1452_v14, %v1459_v15  ;;  %v1518_v26 = vrot.slane %v1510_v21, %v3807_v52  ;;  %v1526_v27 = vcombine.low %v1494_v63, %v1509_v20 }
 0x26b   : > { %1029 = vst.msk [vmem:[#allocation2 + $0x8] sm:$0xff] %vm1027_vm2, %v1017_v18  ;;  %1031 = vst.msk [vmem:[#allocation2 + $0x18] sm:$0xff] %vm1027_vm2, %v1025_v19  ;;  %v1527_v28 = vcombine.high %v1494_v63, %v1509_v20  ;;  %v2717_v29 = vcombine.high %v1452_v14, %v1459_v15  ;;  %v1562_v32 = vcombine.low %v1468_v22, %v1475_v23  ;;  %v2699_v15 = vld [vmem:[#allocation15] ss:$0 sm:$0xff]  ;;  %v2792_v18 = vpop.f32.mrb[1].mxu1 }
 0x26c   : > { %v1525_v30 = vrot.slane %v1511_v24, %v3807_v52  ;;  %v1553_v31 = vrot.slane %v1546_v25, %v3802_v42  ;;  %v2718_v33 = vcombine.high %v1468_v22, %v1475_v23  ;;  %v1534_v34 = vrot.slane %v1526_v27, %v3807_v52  ;;  %v745_v19 = vpop.f32.mrb[2].mxu1  ;;  %v2747_v23 = vld [vmem:[#allocation10] sm:$0xff]  }
 0x26d   : > { %v1541_v35 = vrot.slane %v1527_v28, %v3807_v52  ;;  %v1561_v36 = vrot.slane %v2717_v29, %v3802_v42  ;;  %v1569_v38 = vrot.slane %v1562_v32, %v3802_v42  ;;  %v743_v17 = vadd.f32 %v2699_v15, %v742_v16  ;;  %v2793_v21 = vpop.f32.mrb[3].mxu1 }
 0x26e   : > { %v1577_v39 = vrot.slane %v2718_v33, %v3802_v42  ;;  %v1596_v40 = vcombine.low %v1518_v26, %v1525_v30  ;;  %v2719_v41 = vcombine.high %v1518_v26, %v1525_v30  ;;  %v746_v20 = vadd.f32 %v2699_v15, %v745_v19 }
 0x26f   : > { %v1578_v43 = vcombine.low %v1553_v31, %v1561_v36  ;;  %v1612_v44 = vcombine.low %v1534_v34, %v1541_v35  ;;  %v2720_v45 = vcombine.high %v1534_v34, %v1541_v35  ;;  %v2748_v24 = vunpack.c.l.bf16 %v2747_v23 }
 0x270   : > { %v1586_v46 = vcombine.low %v1569_v38, %v1577_v39  ;;  %v1603_v47 = vrot.slane %v1596_v40, %v3802_v42  ;;  %v1611_v48 = vrot.slane %v2719_v41, %v3802_v42  ;;  %v1658_v49 = vld [vmem:[#allocation2] sm:$0xff]  ;;  %v1660_v1 = vld [vmem:[#allocation2 + $0x10] sm:$0xff]  ;;  %v3896_v22 = vpack.c.bf16 %v746_v20, %v743_v17 }
 0x271   : > { %v1619_v50 = vrot.slane %v1612_v44, %v3802_v42  ;;  %v1627_v51 = vrot.slane %v2720_v45, %v3802_v42  ;;  %v1671_v53 = vsel %vm1027_vm2, %v1658_v49, 0  ;;  %v1585_v57 = vrot.slane %v1578_v43, %v3807_v52 }
 0x272   : > { %v1628_v54 = vcombine.low %v1603_v47, %v1611_v48  ;;  %2803 = vmatpush3.bf16.xpose.msra.mxu1 %v1671_v53  ;;  %v1659_v55 = vld [vmem:[#allocation2 + $0x8] sm:$0xff]  ;;  %v1593_v56 = vrot.slane %v1586_v46, %v3807_v52  ;;  %v1661_v5 = vld [vmem:[#allocation2 + $0x18] sm:$0xff]  ;;  %v1765_v6 = vsel %vm1027_vm2, %v1660_v1, 0  ;;  %v2749_v25 = vunpack.c.h.bf16 %v2747_v23 }
 0x273   : > { %v1636_v58 = vcombine.low %v1619_v50, %v1627_v51  ;;  %v1718_v59 = vsel %vm1027_vm2, %v1659_v55, 0  ;;  %2814 = vmatprep.subr.bf16.mxu1 %v3335_v0  ;;  %v1812_v9 = vsel %vm1027_vm2, %v1661_v5, 0  ;;  %v1043_v20 = vshrl.u32 %v3896_v22, 16 }
 0x274   : > { %2809 = vmatpush3.bf16.xpose.msra.mxu0 %v1718_v59  ;;  %v1594_v60 = vcombine.low %v1585_v57, %v1593_v56  ;;  %v1635_v61 = vrot.slane %v1628_v54, %v3807_v52  ;;  %v1595_v10 = vcombine.high %v1585_v57, %v1593_v56 }
 0x275   : > { %v1643_v62 = vrot.slane %v1636_v58, %v3807_v52  ;;  %2820 = vmatprep.subr.bf16.mxu0 %v3335_v0 }
 0x276   : > { %v1649_v3 = vshrl.u32 %v1594_v60, 16  ;;  %v1655_v13 = vshrl.u32 %v1595_v10, 16 }
 0x277   : > { %v1644_v63 = vcombine.low %v1635_v61, %v1643_v62  ;;  %v1645_v8 = vcombine.high %v1635_v61, %v1643_v62 }
 0x279   : > { %v1648_v2 = vpack.i.b16 %v1644_v63, %v1594_v60  ;;  %v1650_v4 = vshrl.u32 %v1644_v63, 16  ;;  %v1656_v11 = vshrl.u32 %v1645_v8, 16  ;;  %v1654_v12 = vpack.i.b16 %v1645_v8, %v1595_v10 }
 0x27b   : > { %2805 = vmatmul.mubr.msk.bf16.vlgmr.msra.gmra.mrb[4].mxu1 %vm1027_vm2, %v1648_v2  ;;  %v1651_v7 = vpack.i.b16 %v1650_v4, %v1649_v3  ;;  %v1657_v14 = vpack.i.b16 %v1656_v11, %v1655_v13 }
 0x27c   : > { %2815 = vmatpush3.bf16.xpose.msra.mxu1 %v1765_v6  ;;  %2816 = vmatprep.mubr.msk.bf16.mxu1 %vm3336_vm0, %v3335_v0 }
 0x27d   : > { %2811 = vmatmul.mubr.msk.bf16.vlgmr.msra.gmra.mrb[8].mxu0 %vm1027_vm2, %v1651_v7  ;;  %2826 = vmatprep.subr.bf16.mxu1 %v3335_v0 }
 0x27e   : > { %2821 = vmatpush3.bf16.xpose.msra.mxu0 %v1812_v9  ;;  %2822 = vmatprep.mubr.msk.bf16.mxu0 %vm3336_vm0, %v3335_v0 }
 0x27f   : > { %2832 = vmatprep.subr.bf16.mxu0 %v3335_v0 }
 0x283   : > { %2817 = vmatmul.mubr.msk.bf16.vlgmr.msra.gmra.mrb[8].mxu1 %vm1027_vm2, %v1654_v12 }
 0x284   : > { %2828 = vmatprep.mubr.msk.bf16.mxu1 %vm3336_vm0, %v3335_v0 }
 0x285   : > { %2823 = vmatmul.mubr.msk.bf16.vlgmr.msra.gmra.mrb[12].mxu0 %vm1027_vm2, %v1657_v14 }
 0x286   : > { %2834 = vmatprep.mubr.msk.bf16.mxu0 %vm3336_vm0, %v3335_v0 }
 0x34e   : > { %v1707_v26 = vpop.f32.mrb[4].mxu1 }
 0x34f   : > { %v1859_v27 = vadd.f32 %v2748_v24, %v1707_v26  ;;  %v2806_v28 = vpop.f32.mrb[5].mxu1 }
 0x350   : > { %v1710_v29 = vpop.f32.mrb[6].mxu1  ;;  %v1754_v30 = vpop.f32.mrb[8].mxu0 }
 0x351   : > { %v1860_v31 = vadd.f32 %v2749_v25, %v1710_v29  ;;  %v1861_v32 = vadd.f32 %v2748_v24, %v1754_v30  ;;  %v2807_v33 = vpop.f32.mrb[7].mxu1  ;;  %v2812_v34 = vpop.f32.mrb[9].mxu0  ;;  %v1868_v35 = vsel %vm1867_vm3, %v1859_v27, -inf }
 0x352   : > { %1869 = vmax.xlane.f32.xlu0 %v1868_v35  ;;  %v1757_v36 = vpop.f32.mrb[10].mxu0 }
 0x353   : > { %v2813_v38 = vpop.f32.mrb[11].mxu0  ;;  %v1871_v39 = vsel %vm1867_vm3, %v1860_v31, -inf  ;;  %v1862_v40 = vadd.f32 %v2749_v25, %v1757_v36  ;;  %v1874_v41 = vsel %vm1867_vm3, %v1861_v32, -inf }
 0x354   : > { %1872 = vmax.xlane.f32.xlu1 %v1871_v39 }
 0x355   : > { %v1877_v54 = vsel %vm1867_vm3, %v1862_v40, -inf }
 0x356   : > { %v1801_v43 = vpop.f32.mrb[8].mxu1  ;;  %1875 = vmax.xlane.f32.xlu0 %v1874_v41 }
 0x357   : > { %v1863_v44 = vadd.f32 %v2748_v24, %v1801_v43  ;;  %v2818_v45 = vpop.f32.mrb[9].mxu1 }
 0x358   : > { %v1804_v46 = vpop.f32.mrb[10].mxu1  ;;  %v1848_v47 = vpop.f32.mrb[12].mxu0 }
 0x359   : > { %v1864_v48 = vadd.f32 %v2749_v25, %v1804_v46  ;;  %v1865_v49 = vadd.f32 %v2748_v24, %v1848_v47  ;;  %v2819_v50 = vpop.f32.mrb[11].mxu1  ;;  %v2824_v51 = vpop.f32.mrb[13].mxu0  ;;  %v1880_v53 = vsel %vm1867_vm3, %v1863_v44, -inf }
 0x35a   : > { %1881 = vmax.xlane.f32.xlu1 %v1880_v53  ;;  %1878 = vmax.xlane.f32.xlu0 %v1877_v54  ;;  %v1851_v55 = vpop.f32.mrb[14].mxu0 }
 0x35b   : > { %v2825_v56 = vpop.f32.mrb[15].mxu0  ;;  %v1866_v57 = vadd.f32 %v2749_v25, %v1851_v55  ;;  %v1883_v58 = vsel %vm1867_vm3, %v1864_v48, -inf  ;;  %v1886_v59 = vsel %vm1867_vm3, %v1865_v49, -inf }
 0x35d   : > { %v1889_v60 = vsel %vm1867_vm3, %v1866_v57, -inf }
 0x35e   : > { %1884 = vmax.xlane.f32.xlu0 %v1883_v58  ;;  %1887 = vmax.xlane.f32.xlu1 %v1886_v59 }
 0x362   : > { %1890 = vmax.xlane.f32.xlu0 %v1889_v60 }
 0x36f   : > { %1033 = vrot.lane.b32.xlu1 %v3896_v22, %s3338_s21  ;;  %s2483_s21 = scalar_lea.sflag [#allocation6], %s3726_s24 }
 0x373   : > { %1037 = vrot.lane.b32.xlu1 %v3896_v22, %s3337_s6  ;;  %s4057_s6 = scalar_lea.hbm %s4198_s12, %s2745_s5 }
 0x378   : > { %1035 = vrot.lane.b32.xlu0 %v3896_v22, %s3339_s18  ;;  %s3230_s18 = scalar_lea.vmem %s4051_s10, 256 }
 0x379   : > { %p3231_p7 = scmp.ne.s32.totalorder %s4051_s10, %s3230_s18  ;;  %p3238_p12 = scmp.lt.s32.totalorder %s3236_s17, %s3230_s18 }
 0x37b   : > { %p3232_p4 = pnand %p3231_p7, %p4199_p6  ;;  %p3239_p9 = por %p3238_p12, %p3237_p13 }
 0x37d   : > { %p3233_p1 = pneg %p3232_p4 }
 0x37f   : > { %p3240_p0 = pnand %p3239_p9, %p3233_p1 }
 0x3df   : > { %v1870_v61 = vpop.xlane.xlu0 %1869 }
 0x3e0   : > { %v1892_v62 = vsub.f32 %v1859_v27, %v1870_v61 }
 0x3e1   : > { %v1873_v63 = vpop.xlane.xlu1 %1872 }
 0x3e2   : > { %v1900_v1 = vmul.f32 1.442695, %v1892_v62  ;;  %v1893_v2 = vsub.f32 %v1860_v31, %v1873_v63 }
 0x3e3   : > { %v1876_v3 = vpop.xlane.xlu0 %1875 }
 0x3e4   : > { %2996 = vpow2.f32 %v1900_v1  ;;  %v1902_v4 = vmul.f32 1.442695, %v1893_v2  ;;  %v1894_v5 = vsub.f32 %v1861_v32, %v1876_v3 }
 0x3e6   : > { %2998 = vpow2.f32 %v1902_v4  ;;  %v1904_v6 = vmul.f32 1.442695, %v1894_v5 }
 0x3e7   : > { %v1882_v7 = vpop.xlane.xlu1 %1881  ;;  %v1879_v8 = vpop.xlane.xlu0 %1878 }
 0x3e8   : > { %3000 = vpow2.f32 %v1904_v6  ;;  %v1896_v9 = vsub.f32 %v1863_v44, %v1882_v7  ;;  %v1895_v10 = vsub.f32 %v1862_v40, %v1879_v8 }
 0x3ea   : > { %v1908_v11 = vmul.f32 1.442695, %v1896_v9  ;;  %v1906_v12 = vmul.f32 1.442695, %v1895_v10 }
 0x3eb   : > { %v1885_v13 = vpop.xlane.xlu0 %1884  ;;  %v1888_v14 = vpop.xlane.xlu1 %1887 }
 0x3ec   : > { %3002 = vpow2.f32 %v1908_v11  ;;  %v1897_v15 = vsub.f32 %v1864_v48, %v1885_v13  ;;  %v1898_v16 = vsub.f32 %v1865_v49, %v1888_v14 }
 0x3ed   : > { %3004 = vpow2.f32 %v1906_v12 }
 0x3ee   : > { %v3912_v17 = vpop.eup %2996  ;;  %v1910_v18 = vmul.f32 1.442695, %v1897_v15  ;;  %v1912_v19 = vmul.f32 1.442695, %v1898_v16 }
 0x3ef   : > { %v1034_v21 = vpop.permute.xlu1 %1033  ;;  %v1891_v23 = vpop.xlane.xlu0 %1890  ;;  %v1916_v24 = vsel %vm1867_vm3, %v3912_v17, 0.0 }
 0x3f0   : > { %v3917_v25 = vpop.eup %2998  ;;  %3006 = vpow2.f32 %v1910_v18  ;;  %v1041_v26 = vpack.i.b16 %v1034_v21, %v3896_v22  ;;  %v1044_v27 = vshrl.u32 %v1034_v21, 16  ;;  %v1899_v28 = vsub.f32 %v1866_v57, %v1891_v23  ;;  %1917 = vadd.xlane.f32.xlu1 %v1916_v24 }
 0x3f1   : > { %v1919_v29 = vsel %vm1867_vm3, %v3917_v25, 0.0  ;;  %3008 = vpow2.f32 %v1912_v19 }
 0x3f2   : > { %v3922_v30 = vpop.eup %3000  ;;  %v1045_v31 = vpack.i.b16 %v1044_v27, %v1043_v20  ;;  %v1914_v32 = vmul.f32 1.442695, %v1899_v28  ;;  %1920 = vadd.xlane.f32.xlu0 %v1919_v29  ;;  %v1055_v35 = vcombine.high %v1041_v26, %v3800_v37  ;;  %v1062_v44 = vrot.slane %v1041_v26, %v3802_v42 }
 0x3f3   : > { %v1038_v33 = vpop.permute.xlu1 %1037  ;;  %v1036_v34 = vpop.permute.xlu0 %1035  ;;  %v1922_v22 = vsel %vm1867_vm3, %v3922_v30, 0.0 }
 0x3f4   : > { %v1052_v36 = vshrl.u32 %v1038_v33, 16  ;;  %v1049_v38 = vpack.i.b16 %v1038_v33, %v1036_v34  ;;  %v1051_v39 = vshrl.u32 %v1036_v34, 16  ;;  %v1121_v41 = vcombine.high %v1045_v31, %v3800_v37 }
 0x3f5   : > { %3010 = vpow2.f32 %v1914_v32  ;;  %v1069_v48 = vrot.slane %v1055_v35, %v3802_v42  ;;  %v1128_v57 = vrot.slane %v1045_v31, %v3802_v42 }
 0x3f6   : > { %v3927_v40 = vpop.eup %3002  ;;  %1923 = vadd.xlane.f32.xlu0 %v1922_v22  ;;  %v1053_v45 = vpack.i.b16 %v1052_v36, %v1051_v39  ;;  %v1070_v46 = vcombine.high %v1049_v38, %v3800_v37  ;;  %v1077_v47 = vrot.slane %v1049_v38, %v3802_v42  ;;  %v1135_v58 = vrot.slane %v1121_v41, %v3802_v42 }
 0x3f7   : > { %v3930_v43 = vpop.eup %3004  ;;  %v1928_v50 = vsel %vm1867_vm3, %v3927_v40, 0.0 }
 0x3f8   : > { %v1925_v49 = vsel %vm1867_vm3, %v3930_v43, 0.0  ;;  %v1084_v51 = vrot.slane %v1070_v46, %v3802_v42  ;;  %v1085_v53 = vcombine.low %v1062_v44, %v1077_v47  ;;  %v1086_v54 = vcombine.high %v1062_v44, %v1077_v47 }
 0x3f9   : > { %v1136_v55 = vcombine.high %v1053_v45, %v3800_v37  ;;  %1926 = vadd.xlane.f32.xlu1 %v1925_v49  ;;  %v1143_v59 = vrot.slane %v1053_v45, %v3802_v42 }
 0x3fa   : > { %v3942_v56 = vpop.eup %3006  ;;  %1929 = vadd.xlane.f32.xlu0 %v1928_v50  ;;  %v1093_v60 = vrot.slane %v1085_v53, %v3807_v52  ;;  %v1100_v61 = vrot.slane %v1086_v54, %v3807_v52  ;;  %v1101_v62 = vcombine.low %v1069_v48, %v1084_v51  ;;  %v1102_v63 = vcombine.high %v1069_v48, %v1084_v51 }
 0x3fb   : > { %v1150_v1 = vrot.slane %v1136_v55, %v3802_v42  ;;  %v1151_v2 = vcombine.low %v1128_v57, %v1143_v59  ;;  %v1152_v3 = vcombine.high %v1128_v57, %v1143_v59  ;;  %v1931_v4 = vsel %vm1867_vm3, %v3942_v56, 0.0  ;;  %v3954_v9 = vpop.eup %3008 }
 0x3fc   : > { %v1109_v5 = vrot.slane %v1101_v62, %v3807_v52  ;;  %v1116_v6 = vrot.slane %v1102_v63, %v3807_v52  ;;  %v1187_v7 = vcombine.low %v1093_v60, %v1100_v61  ;;  %v2708_v8 = vcombine.high %v1093_v60, %v1100_v61 }
 0x3fd   : > { %1932 = vadd.xlane.f32.xlu1 %v1931_v4  ;;  %v1159_v10 = vrot.slane %v1151_v2, %v3807_v52  ;;  %v1166_v11 = vrot.slane %v1152_v3, %v3807_v52  ;;  %v1167_v12 = vcombine.low %v1135_v58, %v1150_v1  ;;  %v1168_v13 = vcombine.high %v1135_v58, %v1150_v1 }
 0x3fe   : > { %v1194_v14 = vrot.slane %v1187_v7, %v3802_v42  ;;  %v1202_v15 = vrot.slane %v2708_v8, %v3802_v42  ;;  %v1203_v16 = vcombine.low %v1109_v5, %v1116_v6  ;;  %v2709_v18 = vcombine.high %v1109_v5, %v1116_v6 }
 0x3ff   : > { %v3960_v19 = vpop.eup %3010  ;;  %v1175_v20 = vrot.slane %v1167_v12, %v3807_v52  ;;  %v1182_v21 = vrot.slane %v1168_v13, %v3807_v52  ;;  %v1237_v23 = vcombine.low %v1159_v10, %v1166_v11  ;;  %v2710_v24 = vcombine.high %v1159_v10, %v1166_v11 }
 0x400   : > { %v1210_v26 = vrot.slane %v1203_v16, %v3802_v42  ;;  %v1218_v27 = vrot.slane %v2709_v18, %v3802_v42  ;;  %v1219_v28 = vcombine.low %v1194_v14, %v1202_v15  ;;  %v1934_v29 = vsel %vm1867_vm3, %v3954_v9, 0.0 }
 0x401   : > { %v1244_v31 = vrot.slane %v1237_v23, %v3802_v42  ;;  %v1252_v32 = vrot.slane %v2710_v24, %v3802_v42  ;;  %v1253_v33 = vcombine.low %v1175_v20, %v1182_v21  ;;  %v2711_v34 = vcombine.high %v1175_v20, %v1182_v21  ;;  %1935 = vadd.xlane.f32.xlu0 %v1934_v29 }
 0x402   : > { %v1227_v35 = vcombine.low %v1210_v26, %v1218_v27  ;;  %v1937_v36 = vsel %vm1867_vm3, %v3960_v19, 0.0  ;;  %v1226_v41 = vrot.slane %v1219_v28, %v3807_v52 }
 0x403   : > { %v1260_v38 = vrot.slane %v1253_v33, %v3802_v42  ;;  %v1268_v39 = vrot.slane %v2711_v34, %v3802_v42  ;;  %v1269_v22 = vcombine.low %v1244_v31, %v1252_v32  ;;  %1938 = vadd.xlane.f32.xlu1 %v1937_v36  ;;  %v2994_v31 = vld [vmem:[%s4194_s15] sm:$0xff]  }
 0x404   : > { %v1234_v44 = vrot.slane %v1227_v35, %v3807_v52 }
 0x405   : > { %v1277_v45 = vcombine.low %v1260_v38, %v1268_v39  ;;  %v1276_v48 = vrot.slane %v1269_v22, %v3807_v52 }
 0x406   : > { %v1235_v46 = vcombine.low %v1226_v41, %v1234_v44  ;;  %v1236_v47 = vcombine.high %v1226_v41, %v1234_v44 }
 0x407   : > { %v1284_v49 = vrot.slane %v1277_v45, %v3807_v52 }
 0x408   : > { %v1291_v53 = vshrl.u32 %v1235_v46, 16  ;;  %v1299_v54 = vshrl.u32 %v1236_v47, 16 }
 0x409   : > { %v1285_v50 = vcombine.low %v1276_v48, %v1284_v49  ;;  %v1286_v51 = vcombine.high %v1276_v48, %v1284_v49 }
 0x40b   : > { %v1289_v55 = vpack.i.b16 %v1285_v50, %v1235_v46  ;;  %v1292_v57 = vshrl.u32 %v1285_v50, 16  ;;  %v1297_v58 = vpack.i.b16 %v1286_v51, %v1236_v47  ;;  %v1300_v59 = vshrl.u32 %v1286_v51, 16 }
 0x40d   : > { %v1293_v60 = vpack.i.b16 %v1292_v57, %v1291_v53  ;;  %v1301_v61 = vpack.i.b16 %v1300_v59, %v1299_v54  ;;  %1303 = vst.msk [vmem:[#allocation3] sm:$0xff] %vm1027_vm2, %v1289_v55  ;;  %1305 = vst.msk [vmem:[#allocation3 + $0x10] sm:$0xff] %vm1027_vm2, %v1297_v58 }
 0x40f   : > { %1304 = vst.msk [vmem:[#allocation3 + $0x8] sm:$0xff] %vm1027_vm2, %v1293_v60  ;;  %1306 = vst.msk [vmem:[#allocation3 + $0x18] sm:$0xff] %vm1027_vm2, %v1301_v61 }
 0x414   : > { %v1662_v62 = vld [vmem:[#allocation3] sm:$0xff]  ;;  %v1664_v15 = vld [vmem:[#allocation3 + $0x10] sm:$0xff] }
 0x415   : > { %2827 = vmatpush3.bf16.msra.mxu1 %v1662_v62 }
 0x416   : > { %v1663_v63 = vld [vmem:[#allocation3 + $0x8] sm:$0xff]  ;;  %2838 = vmatprep.subr.bf16.mxu1 %v3335_v0  ;;  %v1665_v27 = vld [vmem:[#allocation3 + $0x18] sm:$0xff] }
 0x417   : > { %2833 = vmatpush3.bf16.msra.mxu0 %v1663_v63 }
 0x418   : > { %2844 = vmatprep.subr.bf16.mxu0 %v3335_v0 }
 0x47d   : > { %v1918_v1 = vpop.xlane.xlu1 %1917 }
 0x47e   : > { %3012 = vrcp.f32 %v1918_v1 }
 0x47f   : > { %v1921_v2 = vpop.xlane.xlu0 %1920 }
 0x480   : > { %3014 = vrcp.f32 %v1921_v2 }
 0x483   : > { %v1924_v3 = vpop.xlane.xlu0 %1923 }
 0x484   : > { %3016 = vrcp.f32 %v1924_v3 }
 0x486   : > { %v1927_v4 = vpop.xlane.xlu1 %1926 }
 0x487   : > { %3018 = vrcp.f32 %v1927_v4  ;;  %v1930_v5 = vpop.xlane.xlu0 %1929 }
 0x488   : > { %v3013_v6 = vpop.eup %3012  ;;  %3020 = vrcp.f32 %v1930_v5 }
 0x489   : > { %v1948_v10 = vmul.f32 %v3013_v6, %v3912_v17 }
 0x48a   : > { %v3015_v7 = vpop.eup %3014  ;;  %v1933_v8 = vpop.xlane.xlu1 %1932 }
 0x48b   : > { %v1949_v11 = vmul.f32 %v3015_v7, %v3917_v25  ;;  %3022 = vrcp.f32 %v1933_v8 }
 0x48d   : > { %v1956_v12 = vpack.c.bf16 %v1949_v11, %v1948_v10 }
 0x48e   : > { %v3017_v13 = vpop.eup %3016  ;;  %v1936_v14 = vpop.xlane.xlu0 %1935 }
 0x48f   : > { %2829 = vmatmul.mubr.msk.bf16.vlgmr.msra.gmra.mrb[12].mxu1 %vm1867_vm3, %v1956_v12  ;;  %3024 = vrcp.f32 %v1936_v14  ;;  %v1950_v17 = vmul.f32 %v3017_v13, %v3922_v30 }
 0x490   : > { %2839 = vmatpush3.bf16.msra.mxu1 %v1664_v15  ;;  %2840 = vmatprep.mubr.msk.bf16.mxu1 %vm3336_vm0, %v3335_v0  ;;  %v1939_v18 = vpop.xlane.xlu1 %1938 }
 0x491   : > { %v3019_v16 = vpop.eup %3018  ;;  %2850 = vmatprep.subr.bf16.mxu1 %v3335_v0  ;;  %3026 = vrcp.f32 %v1939_v18 }
 0x492   : > { %v1951_v25 = vmul.f32 %v3019_v16, %v3930_v43  ;;  %v3021_v20 = vpop.eup %3020 }
 0x493   : > { %v1952_v24 = vmul.f32 %v3021_v20, %v3927_v40 }
 0x494   : > { %v1957_v21 = vpack.c.bf16 %v1951_v25, %v1950_v17 }
 0x495   : > { %v3023_v23 = vpop.eup %3022 }
 0x496   : > { %v1953_v26 = vmul.f32 %v3023_v23, %v3942_v56  ;;  %2835 = vmatmul.mubr.msk.bf16.vlgmr.msra.gmra.mrb[16].mxu0 %vm1867_vm3, %v1957_v21 }
 0x497   : > { %2845 = vmatpush3.bf16.msra.mxu0 %v1665_v27  ;;  %2846 = vmatprep.mubr.msk.bf16.mxu0 %vm3336_vm0, %v3335_v0 }
 0x498   : > { %v1958_v28 = vpack.c.bf16 %v1953_v26, %v1952_v24 }
 0x499   : > { %v3025_v29 = vpop.eup %3024 }
 0x49a   : > { %2841 = vmatmul.mubr.msk.bf16.vlgmr.msra.gmra.mrb[16].mxu1 %vm1867_vm3, %v1958_v28  ;;  %v1954_v43 = vmul.f32 %v3025_v29, %v3954_v9 }
 0x49b   : > { %2854 = vmatprep.mubr.msk.bf16.mxu1 %vm3336_vm0, %v3335_v0  ;;  %v3027_v30 = vpop.eup %3026  ;;  %2851 = vmatpush3.bf16.msra.mxu1 %v2994_v31 }
 0x49c   : > { %v1955_v40 = vmul.f32 %v3027_v30, %v3960_v19  ;;  %2852 = vmatprep.subr.bf16.mxu1 %v3335_v0 }
 0x49e   : > { %v1959_v56 = vpack.c.bf16 %v1955_v40, %v1954_v43 }
 0x4a0   : > { %2847 = vmatmul.mubr.msk.bf16.vlgmr.msra.gmra.mrb[20].mxu0 %vm1867_vm3, %v1959_v56 }
 0x562   : > { %v1997_v32 = vpop.f32.mrb[12].mxu1 }
 0x563   : > { %v2830_v33 = vpop.f32.mrb[13].mxu1 }
 0x564   : > { %v2000_v34 = vpop.f32.mrb[14].mxu1 }
 0x565   : > { %v2136_v35 = vpack.c.bf16 %v2000_v34, %v1997_v32  ;;  %v2831_v36 = vpop.f32.mrb[15].mxu1 }
 0x567   : > { %v2144_v44 = vshrl.u32 %v2136_v35, 16 }
 0x569   : > { %v2041_v38 = vpop.f32.mrb[16].mxu0 }
 0x56a   : > { %v2836_v39 = vpop.f32.mrb[17].mxu0 }
 0x56b   : > { %v2044_v9 = vpop.f32.mrb[18].mxu0 }
 0x56c   : > { %v2137_v22 = vpack.c.bf16 %v2044_v9, %v2041_v38  ;;  %v2837_v19 = vpop.f32.mrb[19].mxu0 }
 0x56d   : > { %v2085_v41 = vpop.f32.mrb[16].mxu1 }
 0x56e   : > { %v2142_v45 = vpack.i.b16 %v2137_v22, %v2136_v35  ;;  %v2145_v46 = vshrl.u32 %v2137_v22, 16  ;;  %v2842_v47 = vpop.f32.mrb[17].mxu1 }
 0x56f   : > { %v2088_v48 = vpop.f32.mrb[18].mxu1 }
 0x570   : > { %v2146_v49 = vpack.i.b16 %v2145_v46, %v2144_v44  ;;  %v2138_v50 = vpack.c.bf16 %v2088_v48, %v2085_v41  ;;  %v2843_v51 = vpop.f32.mrb[19].mxu1  ;;  %v2156_v58 = vcombine.high %v2142_v45, %v3800_v37  ;;  %v2163_v62 = vrot.slane %v2142_v45, %v3802_v42  ;;  %v2995_v41 = vld [vmem:[%s4194_s15 + $0x8] sm:$0xff]  }
 0x571   : > { %2853 = vmatpush3.bf16.msra.mxu1 %v2995_v41 }
 0x572   : > { %v2152_v59 = vshrl.u32 %v2138_v50, 16  ;;  %v2170_v3 = vrot.slane %v2156_v58, %v3802_v42  ;;  %v2222_v4 = vcombine.high %v2146_v49, %v3800_v37  ;;  %v2229_v10 = vrot.slane %v2146_v49, %v3802_v42 }
 0x573   : > { %v2129_v0 = vpop.f32.mrb[20].mxu0 }
 0x574   : > { %v2848_v53 = vpop.f32.mrb[21].mxu0  ;;  %v2236_v16 = vrot.slane %v2222_v4, %v3802_v42 }
 0x575   : > { %v2132_v54 = vpop.f32.mrb[22].mxu0 }
 0x576   : > { %v2139_v55 = vpack.c.bf16 %v2132_v54, %v2129_v0  ;;  %v2849_v57 = vpop.f32.mrb[23].mxu0 }
 0x578   : > { %v2150_v60 = vpack.i.b16 %v2139_v55, %v2138_v50  ;;  %v2153_v61 = vshrl.u32 %v2139_v55, 16 }
 0x57a   : > { %v2154_v63 = vpack.i.b16 %v2153_v61, %v2152_v59  ;;  %v2171_v1 = vcombine.high %v2150_v60, %v3800_v37  ;;  %v2178_v2 = vrot.slane %v2150_v60, %v3802_v42 }
 0x57c   : > { %v2185_v5 = vrot.slane %v2171_v1, %v3802_v42  ;;  %v2186_v6 = vcombine.low %v2163_v62, %v2178_v2  ;;  %v2187_v7 = vcombine.high %v2163_v62, %v2178_v2  ;;  %v2237_v8 = vcombine.high %v2154_v63, %v3800_v37 }
 0x57d   : > { %v2244_v11 = vrot.slane %v2154_v63, %v3802_v42 }
 0x57e   : > { %v2194_v12 = vrot.slane %v2186_v6, %v3807_v52  ;;  %v2201_v13 = vrot.slane %v2187_v7, %v3807_v52  ;;  %v2202_v14 = vcombine.low %v2170_v3, %v2185_v5  ;;  %v2203_v15 = vcombine.high %v2170_v3, %v2185_v5  ;;  %v2733_v6 = vld [vmem:[%s4196_s27] ss:$0 sm:$0xff] }
 0x57f   : > { %v2251_v18 = vrot.slane %v2237_v8, %v3802_v42  ;;  %v2252_v17 = vcombine.low %v2229_v10, %v2244_v11  ;;  %v2253_v25 = vcombine.high %v2229_v10, %v2244_v11 }
 0x580   : > { %v2210_v20 = vrot.slane %v2202_v14, %v3807_v52  ;;  %v2217_v37 = vrot.slane %v2203_v15, %v3807_v52  ;;  %v2288_v21 = vcombine.low %v2194_v12, %v2201_v13  ;;  %v2729_v23 = vcombine.high %v2194_v12, %v2201_v13 }
 0x581   : > { %v2260_v24 = vrot.slane %v2252_v17, %v3807_v52  ;;  %v2267_v26 = vrot.slane %v2253_v25, %v3807_v52  ;;  %v2268_v27 = vcombine.low %v2236_v16, %v2251_v18  ;;  %v2269_v28 = vcombine.high %v2236_v16, %v2251_v18 }
 0x582   : > { %v2304_v29 = vcombine.low %v2210_v20, %v2217_v37  ;;  %v2730_v30 = vcombine.high %v2210_v20, %v2217_v37  ;;  %v2295_v43 = vrot.slane %v2288_v21, %v3802_v42  ;;  %v2303_v40 = vrot.slane %v2729_v23, %v3802_v42 }
 0x583   : > { %v2276_v56 = vrot.slane %v2268_v27, %v3807_v52  ;;  %v2283_v31 = vrot.slane %v2269_v28, %v3807_v52  ;;  %v2338_v32 = vcombine.low %v2260_v24, %v2267_v26  ;;  %v2731_v33 = vcombine.high %v2260_v24, %v2267_v26 }
 0x584   : > { %v2311_v34 = vrot.slane %v2304_v29, %v3802_v42  ;;  %v2319_v35 = vrot.slane %v2730_v30, %v3802_v42  ;;  %v2320_v36 = vcombine.low %v2295_v43, %v2303_v40 }
 0x585   : > { %v2345_v38 = vrot.slane %v2338_v32, %v3802_v42  ;;  %v2353_v39 = vrot.slane %v2731_v33, %v3802_v42  ;;  %v2354_v9 = vcombine.low %v2276_v56, %v2283_v31  ;;  %v2732_v22 = vcombine.high %v2276_v56, %v2283_v31 }
 0x586   : > { %v2328_v19 = vcombine.low %v2311_v34, %v2319_v35  ;;  %v2327_v47 = vrot.slane %v2320_v36, %v3807_v52 }
 0x587   : > { %v2361_v44 = vrot.slane %v2354_v9, %v3802_v42  ;;  %v2369_v45 = vrot.slane %v2732_v22, %v3802_v42  ;;  %v2370_v46 = vcombine.low %v2345_v38, %v2353_v39 }
 0x588   : > { %v2335_v48 = vrot.slane %v2328_v19, %v3807_v52 }
 0x589   : > { %v2378_v49 = vcombine.low %v2361_v44, %v2369_v45  ;;  %v2377_v0 = vrot.slane %v2370_v46, %v3807_v52 }
 0x58a   : > { %v2337_v50 = vcombine.high %v2327_v47, %v2335_v48  ;;  %v2336_v51 = vcombine.low %v2327_v47, %v2335_v48 }
 0x58b   : > { %v2385_v53 = vrot.slane %v2378_v49, %v3807_v52 }
 0x58c   : > { %v2391_v57 = vshrl.u32 %v2336_v51, 16  ;;  %v2397_v58 = vshrl.u32 %v2337_v50, 16 }
 0x58d   : > { %v2387_v54 = vcombine.high %v2377_v0, %v2385_v53  ;;  %v2386_v55 = vcombine.low %v2377_v0, %v2385_v53 }
 0x58f   : > { %v2396_v59 = vpack.i.b16 %v2387_v54, %v2337_v50  ;;  %v2392_v60 = vshrl.u32 %v2386_v55, 16  ;;  %v2398_v42 = vshrl.u32 %v2387_v54, 16  ;;  %v2390_v61 = vpack.i.b16 %v2386_v55, %v2336_v51 }
 0x591   : > { %2402 = vrot.lane.b32.xlu1 %v2396_v59, %s3343_s7  ;;  %v2393_v62 = vpack.i.b16 %v2392_v60, %v2391_v57  ;;  %v2399_v63 = vpack.i.b16 %v2398_v42, %v2397_v58 }
 0x593   : > { %2400 = vrot.lane.b32.xlu0 %v2393_v62, %s3344_s3 }
 0x595   : > { %2404 = vrot.lane.b32.xlu1 %v2399_v63, %s3345_s8 }
 0x603   : > { %v2403_v52 = vpop.permute.xlu1 %2402 }
 0x605   : > { %v2401_v1 = vpop.permute.xlu0 %2400 }
 0x606   : > { %v2408_v2 = vsel %vm1027_vm2, %v2390_v61, %v2401_v1 }
 0x607   : > { %v2405_v3 = vpop.permute.xlu1 %2404  ;;  %v2410_v4 = vsel %vm1867_vm3, %v2408_v2, %v2403_v52 }
 0x608   : > { %v2413_v5 = vsel %vm2411_vm4, %v2410_v4, %v2405_v3 }
 0x609   : > { %2855 = vmatmul.mubr.msk.bf16.vlgmr.msra.gmra.mrb[20].mxu1 %vm629_vm1, %v2413_v5 }
 0x6dc   : > { %v2473_v7 = vpop.f32.mrb[20].mxu1 }
 0x6dd   : > { %v2474_v8 = vadd.f32 %v2733_v6, %v2473_v7  ;;  %v2856_v10 = vpop.f32.mrb[21].mxu1 }
 0x6de   : > { %v2476_v11 = vpop.f32.mrb[22].mxu1 }
 0x6df   : > { %2480 = vst.msk [vmem:[%s590_s14] sm:$0xff] %vm629_vm1, %v2474_v8  ;;  %v2477_v12 = vadd.f32 %v2733_v6, %v2476_v11  ;;  %v2857_v13 = vpop.f32.mrb[23].mxu1 }
 0x6e1   : > { %2481 = vst.msk [vmem:[%s590_s14 + $0x8] sm:$0xff] %vm629_vm1, %v2477_v12 }
 0x6e2   : > { %3243 = shalt.err (!%p3240_p0)
}
 0x6e3   : > { %s3244_s30 = scalar_lea.hbm %s4057_s6, 256  ;;  %s3248_s8 = scalar_lea.hbm %s4198_s12, 512 }
 0x6e4   : > { %p3245_p8 = scmp.ne.s32.totalorder %s4057_s6, %s3244_s30  ;;  %p3249_p2 = scmp.lt.u32.totalorder %s4057_s6, %s4198_s12 }
 0x6e5   : > { %p3250_p10 = scmp.lt.u32.totalorder %s3248_s8, %s3244_s30  ;;  %p3252_p7 = scmp.lt.u32.totalorder %s3244_s30, %s4057_s6 }
 0x6e6   : > { %p3246_p3 = pnand %p3245_p8, %p4199_p6 }
 0x6e7   : > { %p3251_p5 = por %p3250_p10, %p3249_p2 }
 0x6e8   : > { %p3247_p11 = pneg %p3246_p3 }
 0x6e9   : > { %p3253_p4 = por %p3252_p7, %p3251_p5 }
 0x6eb   : > { %p3254_p1 = pnand %p3253_p4, %p3247_p11 }
 0x6ed   : > { %3257 = shalt.err (!%p3254_p1)
}
 0x6ee   : > { %s3347_s19 = smov 128  }
 0x6ef   : > { %2880 = dma.vmem_to_hbm [thread:$0]  (%p4199_p6), %s4051_s10, 256, %s4057_s6, %s2483_s21, %s3347_s19, %s3347_s19, %s3344_s3  }
 0x6f0 PF: > { %s4200_s27 = sld [smem:[#allocation22_spill]]  ;;  %s4201_s14 = sld [smem:[#allocation26_spill]] }
 0x6f1   : > { %s4202_s5 = sld [smem:[#allocation25_spill]] }
 0x6f6   : > { %s2513_s25 = sand.u32 1, %s4200_s27   ;;  %p4203_p13 = scmp.ne.s32.totalorder %s4201_s14, 0 }
 0x6f7   : > { %p4204_p12 = scmp.ge.s32.totalorder %s4202_s5, 2  ;;  %s2514_s1 = scalar_lea.sflag [#allocation6], %s2513_s25 }
 0x6f9   : > { %p2906_p9 = pnand %p4204_p12, %p4203_p13 }
 0x6fb   : > { %3299 = dma.done.wait (!%p2906_p9), %s2514_s1, 256  }
 0x6fc   : > { %3301 = vsyncadd (!%p2906_p9), %s2514_s1, 4294967040  ;;  %s33_s26 = sadd.s32 1, %s4202_s5   ;;  %s4205_s24 = sld [smem:[#allocation29_spill]] }
 0x6fd   : > { %p30_p0 = scmp.ge.s32.totalorder %s33_s26, 4   ;;  %s4206_s28 = sld [smem:[#allocation24_spill]] }
 0x6fe   : > { %s4207_s25 = sld [smem:[#allocation27_spill]]  ;;  %s4208_s21 = smov %s3308_s22 }
 0x6ff   : > { %s4209_s22 = smov %s3312_s23  ;;  %32 = sbr.rel (!%p30_p0) target bundleno = 20 (0x14), region = 158 }
 0x702   : > { %s4210_s23 = smov %s4205_s24 }
 0x703   : > { %s4211_s24 = smov %s4206_s28 }
 0x706   :  { %2519 = vsyncpa [#allocation5], 1 }
 0x707   :  { %2521 = vsyncpa [#allocation5 + $0x1], 1 }
 0x708   :  { %2522 = vsyncpa [#allocation8], 1 }
 0x709   :  { %2524 = vsyncpa [#allocation8 + $0x1], 1 }
 0x70a   :  { %2525 = vsyncpa [#allocation11], 1 }
 0x70b   :  { %2526 = vsyncpa [#allocation14], 1 }
 0x70c   :  { %2527 = vsyncpa [#allocation6], 1 }
 0x70d   :  { %2529 = vsyncpa [#allocation6 + $0x1], 1 }

</bundles_post_ra>
